<compile_context>
chip_gen: v7x
topology: tpu7x:2x2x1
jax: 0.10.0
libtpu: 0.0.40
codegen_flags: <defaults>
</compile_context>

<pallas_src>
import jax
import jax.numpy as jnp
from jax.experimental import pallas as pl
from jax.experimental.pallas import tpu as pltpu


# ---------------------------------------------------------------------------
# Fused Pallas kernel (built as a closure over the static grid geometry)
# ---------------------------------------------------------------------------
def _make_fused_kernel(M, Wo):
    """Fused reduction kernel for an Ho x Wo output grid (M = Ho * Wo rows)."""
    HALO = Wo + 1                       # rows of zero padding needed around the data
    D0 = ((HALO + 7) // 8) * 8          # sublane-aligned start of the data region

    def kernel(xs_ref, w2_ref, ba_ref, wb_ref, bb_ref, wr_ref, o_ref,
               xsrc0, xsrc1, ysrc0, ysrc1, ysrc2):
        cp = o_ref.shape[2]
        k1p = xs_ref.shape[2]
        f32 = jnp.float32
        bf16 = jnp.bfloat16

        # Hoisted column masks (applied to the *source*, once per slab):
        #   mask_r zeroes col == Wo-1  -> serves every dw = -1 tap
        #   mask_l zeroes col == 0     -> serves every dw = +1 tap
        col = jax.lax.broadcasted_iota(jnp.int32, (M, 1), 0) % Wo
        mask_r = col != (Wo - 1)
        mask_l = col != 0

        # Zero the halo rows every step (cheap; keeps the kernel correct when the
        # batch grid axis is split across TensorCores).
        zx = jnp.zeros((HALO, k1p), bf16)
        zy = jnp.zeros((HALO, cp), bf16)
        xsrc0[D0 - HALO:D0, :] = zx
        xsrc1[D0 - HALO:D0, :] = zx
        for yref in (ysrc0, ysrc1, ysrc2):
            yref[D0 - HALO:D0, :] = zy
            yref[D0 + M:D0 + M + HALO, :] = zy

        xs = xs_ref[0]                                     # (M, k1p) bf16

        # ---- Residual: AvgPool2x2 + 1x1 conv folded into one matmul on the raw
        #      space-to-depth input (computed first so xs dies early).
        res = jnp.dot(xs, wr_ref[...], preferred_element_type=f32)

        # ---- Stage-1 tap sources (ReLU'd) into the halo scratch.
        xs_relu = jnp.maximum(xs, 0)                       # bf16
        xsrc0[D0:D0 + M, :] = xs_relu
        xsrc1[D0:D0 + M, :] = jnp.where(mask_r, xs_relu, 0)

        # ---- Stage 1: conv_a (3x3, stride 2, pad 1) expressed as a 2x2 conv over the
        #      space-to-depth input. BN scale folded into w2. Taps are plain offset
        #      slices of the scratch -> clean back-to-back dot chain.
        acc1 = jnp.dot(xsrc1[D0 - Wo - 1:D0 - Wo - 1 + M, :], w2_ref[0],
                       preferred_element_type=f32)                      # (bi=-1, bj=-1)
        acc1 += jnp.dot(xsrc0[D0 - Wo:D0 - Wo + M, :], w2_ref[1],
                        preferred_element_type=f32)                     # (bi=-1, bj= 0)
        acc1 += jnp.dot(xsrc1[D0 - 1:D0 - 1 + M, :], w2_ref[2],
                        preferred_element_type=f32)                     # (bi= 0, bj=-1)
        acc1 += jnp.dot(xs_relu, w2_ref[3],
                        preferred_element_type=f32)                     # (bi= 0, bj= 0)
        y1 = acc1 + ba_ref[...]                            # conv_a BN bias (f32)

        # ---- Stage-2 tap sources: ReLU in f32, masked in f32, cast to bf16 once.
        y1r = jnp.maximum(y1, 0.0)                         # f32
        y1r_bf = y1r.astype(bf16)
        ysrc0[D0:D0 + M, :] = y1r_bf
        ysrc1[D0:D0 + M, :] = jnp.where(mask_r, y1r, 0.0).astype(bf16)
        ysrc2[D0:D0 + M, :] = jnp.where(mask_l, y1r, 0.0).astype(bf16)

        # ---- Stage 2: conv_b (3x3, stride 1, pad 1) on the VMEM-resident y1 tile.
        #      Residual and conv_b BN bias folded into the accumulator init.
        acc2 = res + bb_ref[...]
        for dh in (-1, 0, 1):
            for dw in (-1, 0, 1):
                t = (dh + 1) * 3 + (dw + 1)
                if dh == 0 and dw == 0:
                    tap = y1r_bf                            # reuse live value
                else:
                    src = ysrc1 if dw == -1 else (ysrc2 if dw == 1 else ysrc0)
                    s = D0 + dh * Wo + dw                   # static offset
                    tap = src[s:s + M, :]
                acc2 += jnp.dot(tap, wb_ref[t], preferred_element_type=f32)

        o_ref[0] = acc2.astype(o_ref.dtype)                 # bf16 store (lane dense)

    return kernel, D0


# ---------------------------------------------------------------------------
# Parameter construction (deterministic, shapes per module __init__)
# ---------------------------------------------------------------------------
def init_params(key, cin, cout, eps=1e-5):
    ks = jax.random.split(key, 7)
    wa = jax.random.normal(ks[0], (cout, cin, 3, 3), jnp.float32) * 0.1   # conv_a (OIHW)
    ga = 1.0 + 0.1 * jax.random.normal(ks[1], (cout,), jnp.float32)       # BN gamma
    ba = 0.1 * jax.random.normal(ks[2], (cout,), jnp.float32)             # BN beta
    wb = jax.random.normal(ks[3], (cout, cout, 3, 3), jnp.float32) * 0.1  # conv_b (OIHW)
    gb = 1.0 + 0.1 * jax.random.normal(ks[4], (cout,), jnp.float32)
    bb = 0.1 * jax.random.normal(ks[5], (cout,), jnp.float32)
    wr = jax.random.normal(ks[6], (cout, cin, 1, 1), jnp.float32) * 0.1   # residual 1x1

    # Fresh BatchNorm running stats (inference mode) -> per-channel scale / bias.
    mean = jnp.zeros((cout,), jnp.float32)
    var = jnp.ones((cout,), jnp.float32)
    scale_a = ga / jnp.sqrt(var + eps)
    bias_a = ba - mean * scale_a
    scale_b = gb / jnp.sqrt(var + eps)
    bias_b = bb - mean * scale_b

    cp = ((cout + 127) // 128) * 128      # lane-dense padded output channel count
    k1 = 4 * cin                          # space-to-depth channel count
    k1p = ((k1 + 127) // 128) * 128       # lane-dense padded s2d channel count

    # conv_a as a 2x2 conv over space-to-depth(2) input; BN scale folded into the
    # output columns; zero padded to (k1p, cp).
    wa_s = wa * scale_a[:, None, None, None]
    w2 = jnp.zeros((4, k1p, cp), jnp.float32)
    for bi in (-1, 0):
        for bj in (-1, 0):
            t = (bi + 1) * 2 + (bj + 1)
            for p_ in (0, 1):
                kh = 2 * bi + p_ + 1
                if not 0 <= kh < 3:
                    continue
                for q_ in (0, 1):
                    kw = 2 * bj + q_ + 1
                    if not 0 <= kw < 3:
                        continue
                    c0 = (p_ * 2 + q_) * cin
                    w2 = w2.at[t, c0:c0 + cin, :cout].set(wa_s[:, :, kh, kw].T)

    # conv_b: nine per-tap (cp, cp) matrices, BN scale folded in, zero padded.
    wb_s = wb * scale_b[:, None, None, None]
    wbt = jnp.zeros((9, cp, cp), jnp.float32)
    for dh in (-1, 0, 1):
        for dw in (-1, 0, 1):
            t = (dh + 1) * 3 + (dw + 1)
            wbt = wbt.at[t, :cout, :cout].set(wb_s[:, :, dh + 1, dw + 1].T)

    # Residual: AvgPool2x2 + 1x1 conv folded into one (k1p, cp) matrix acting on the
    # space-to-depth input (pool == mean over the 4 phase channel groups).
    wr_mat = wr.reshape(cout, cin).T / 4.0          # (cin, cout)
    wrt = jnp.zeros((k1p, cp), jnp.float32)
    for t in range(4):
        wrt = wrt.at[t * cin:(t + 1) * cin, :cout].set(wr_mat)

    ba_p = jnp.zeros((1, cp), jnp.float32).at[0, :cout].set(bias_a)
    bb_p = jnp.zeros((1, cp), jnp.float32).at[0, :cout].set(bias_b)

    return dict(
        # raw parameters (used by the pure-JAX reference)
        wa=wa, wb=wb, wr=wr,
        scale_a=scale_a, bias_a=bias_a, scale_b=scale_b, bias_b=bias_b,
        # kernel-ready parameters
        w2=w2.astype(jnp.bfloat16), wbt=wbt.astype(jnp.bfloat16),
        wrt=wrt.astype(jnp.bfloat16), ba=ba_p, bb=bb_p,
        cout=cout, cp=cp, k1=k1, k1p=k1p,
    )


# ---------------------------------------------------------------------------
# Forward pass (public API: NCHW in, NCHW out)
# ---------------------------------------------------------------------------
def reduction_forward(x_nchw, params):
    N, Cin, H, W = x_nchw.shape
    assert H % 2 == 0 and W % 2 == 0, "stride-2 reduction expects even H, W"
    Ho, Wo = H // 2, W // 2
    M = Ho * Wo
    cout, cp = params["cout"], params["cp"]
    k1, k1p = params["k1"], params["k1p"]
    assert k1 == 4 * Cin

    # bf16 BEFORE the layout transform -> transpose/reshape traffic is halved.
    # Space-to-depth(2): xs[n, i*Wo + j, (p*2 + q)*Cin + c] = x[n, 2i + p, 2j + q, c]
    x = jnp.transpose(x_nchw.astype(jnp.bfloat16), (0, 2, 3, 1))        # NHWC bf16
    xs = x.reshape(N, Ho, 2, Wo, 2, Cin).transpose(0, 1, 3, 2, 4, 5)
    xs = xs.reshape(N, M, k1)
    if k1p != k1:
        xs = jnp.pad(xs, ((0, 0), (0, 0), (0, k1p - k1)))               # lane dense

    kernel, D0 = _make_fused_kernel(M, Wo)
    halo = Wo + 1

    flops = int(2 * N * M * cp * (5 * k1p + 9 * cp))
    bytes_accessed = int(N * M * (k1p + cp) * 2
                         + (4 * k1p * cp + 9 * cp * cp + k1p * cp) * 2
                         + 2 * cp * 4)

    out = pl.pallas_call(
        kernel,
        out_shape=jax.ShapeDtypeStruct((N, M, cp), jnp.bfloat16),
        grid=(N,),
        in_specs=[
            pl.BlockSpec((1, M, k1p), lambda n: (n, 0, 0)),     # space-to-depth x (bf16)
            pl.BlockSpec((4, k1p, cp), lambda n: (0, 0, 0)),    # conv_a tap weights
            pl.BlockSpec((1, cp), lambda n: (0, 0)),            # conv_a BN bias
            pl.BlockSpec((9, cp, cp), lambda n: (0, 0, 0)),     # conv_b tap weights
            pl.BlockSpec((1, cp), lambda n: (0, 0)),            # conv_b BN bias
            pl.BlockSpec((k1p, cp), lambda n: (0, 0)),          # residual weight
        ],
        out_specs=pl.BlockSpec((1, M, cp), lambda n: (n, 0, 0)),
        scratch_shapes=[
            pltpu.VMEM((D0 + M, k1p), jnp.bfloat16),            # xs_relu (unmasked)
            pltpu.VMEM((D0 + M, k1p), jnp.bfloat16),            # xs_relu (right-masked)
            pltpu.VMEM((D0 + M + halo, cp), jnp.bfloat16),      # y1r (unmasked)
            pltpu.VMEM((D0 + M + halo, cp), jnp.bfloat16),      # y1r (right-masked)
            pltpu.VMEM((D0 + M + halo, cp), jnp.bfloat16),      # y1r (left-masked)
        ],
        compiler_params=pltpu.CompilerParams(
            dimension_semantics=("parallel",),
            vmem_limit_bytes=64 * 1024 * 1024),
        cost_estimate=pl.CostEstimate(
            flops=flops, transcendentals=0, bytes_accessed=bytes_accessed),
    )(xs, params["w2"], params["ba"], params["wbt"], params["bb"], params["wrt"])

    out = out[:, :, :cout].reshape(N, Ho, Wo, cout)
    return jnp.transpose(out, (0, 3, 1, 2)).astype(jnp.float32)          # back to NCHW


# ---------------------------------------------------------------------------
# Pure-JAX reference (for correctness check)
# ---------------------------------------------------------------------------
def reference_forward(x, p):
    def conv(z, w, s, pad):
        return jax.lax.conv_general_dilated(
            z, w, (s, s), ((pad, pad), (pad, pad)),
            dimension_numbers=("NCHW", "OIHW", "NCHW"))

    a = conv(jnp.maximum(x, 0.0), p["wa"], 2, 1)
    a = a * p["scale_a"].reshape(1, -1, 1, 1) + p["bias_a"].reshape(1, -1, 1, 1)
    b = conv(jnp.maximum(a, 0.0), p["wb"], 1, 1)
    b = b * p["scale_b"].reshape(1, -1, 1, 1) + p["bias_b"].reshape(1, -1, 1, 1)
    N, C, H, W = x.shape
    pool = x.reshape(N, C, H // 2, 2, W // 2, 2).mean(axis=(3, 5))
    res = conv(pool, p["wr"], 1, 0)
    return res + b


if __name__ == "__main__":
    key = jax.random.PRNGKey(0)
    k_x, k_p = jax.random.split(key)

    N, Cin, Cout, H, W = 2, 4, 8, 16, 16
    x = jax.random.normal(k_x, (N, Cin, H, W), jnp.float32)
    params = init_params(k_p, Cin, Cout)

    out = reduction_forward(x, params)
    out = jax.block_until_ready(out)

    ref = reference_forward(x, params)
    assert out.shape == (N, Cout, H // 2, W // 2), out.shape
    # bf16 operands + bf16 output inside the kernel -> loosened tolerance vs f32 ref.
    assert jnp.allclose(out, ref, atol=3e-2, rtol=3e-2), "mismatch vs reference"

    print("KERNEL_OK")
</pallas_src>

<mosaic_0001>
module attributes {stable_mosaic.version = 11 : i64} {
  func.func @kernel(%arg0: i32, %arg1: memref<1x64x128xbf16, #tpu.memory_space<vmem>>, %arg2: memref<4x128x128xbf16, #tpu.memory_space<vmem>>, %arg3: memref<1x128xf32, #tpu.memory_space<vmem>>, %arg4: memref<9x128x128xbf16, #tpu.memory_space<vmem>>, %arg5: memref<1x128xf32, #tpu.memory_space<vmem>>, %arg6: memref<128x128xbf16, #tpu.memory_space<vmem>>, %arg7: memref<1x64x128xbf16, #tpu.memory_space<vmem>>, %arg8: memref<80x128xbf16, #tpu.memory_space<vmem>>, %arg9: memref<80x128xbf16, #tpu.memory_space<vmem>>, %arg10: memref<89x128xbf16, #tpu.memory_space<vmem>>, %arg11: memref<89x128xbf16, #tpu.memory_space<vmem>>, %arg12: memref<89x128xbf16, #tpu.memory_space<vmem>>) attributes {dimension_semantics = [#tpu.dimension_semantics<parallel>], iteration_bounds = array<i64: 2>, scalar_prefetch = 0 : i64, scratch_operands = 5 : i64, tpu.core_type = #tpu.core_type<tc>, window_params = [{transform_indices = @transform_0, window_bounds = array<i64: 1, 64, 128>}, {pipeline_mode = #tpu.pipeline_mode<synchronous>, transform_indices = @transform_1, window_bounds = array<i64: 4, 128, 128>}, {pipeline_mode = #tpu.pipeline_mode<synchronous>, transform_indices = @transform_2, window_bounds = array<i64: 1, 128>}, {pipeline_mode = #tpu.pipeline_mode<synchronous>, transform_indices = @transform_3, window_bounds = array<i64: 9, 128, 128>}, {pipeline_mode = #tpu.pipeline_mode<synchronous>, transform_indices = @transform_4, window_bounds = array<i64: 1, 128>}, {pipeline_mode = #tpu.pipeline_mode<synchronous>, transform_indices = @transform_5, window_bounds = array<i64: 128, 128>}, {transform_indices = @transform_6, window_bounds = array<i64: 1, 64, 128>}]} {
    %0 = tpu.iota {dimensions = array<i32: 0>} : vector<64x1xi32>
    %c8_i32 = arith.constant 8 : i32
    %c0_i32 = arith.constant 0 : i32
    %1 = arith.cmpi eq, %c8_i32, %c0_i32 : i32
    %c1_i32 = arith.constant 1 : i32
    %2 = arith.select %1, %c1_i32, %c8_i32 : i32
    %3 = vector.broadcast %2 : i32 to vector<64x1xi32>
    %4 = arith.remsi %0, %3 : vector<64x1xi32>
    %c0_i32_0 = arith.constant 0 : i32
    %5 = vector.broadcast %c0_i32_0 : i32 to vector<64x1xi32>
    %6 = arith.cmpi ne, %4, %5 : vector<64x1xi32>
    %c0_i32_1 = arith.constant 0 : i32
    %7 = vector.broadcast %c0_i32_1 : i32 to vector<64x1xi32>
    %8 = arith.cmpi slt, %4, %7 : vector<64x1xi32>
    %c0_i32_2 = arith.constant 0 : i32
    %9 = arith.cmpi slt, %2, %c0_i32_2 : i32
    %10 = vector.broadcast %9 : i1 to vector<64x1xi1>
    %11 = vector.broadcast %10 : vector<64x1xi1> to vector<64x1xi1>
    %12 = arith.xori %8, %11 : vector<64x1xi1>
    %13 = arith.andi %12, %6 : vector<64x1xi1>
    %14 = vector.broadcast %2 : i32 to vector<64x1xi32>
    %15 = arith.addi %4, %14 : vector<64x1xi32>
    %16 = arith.select %13, %15, %4 : vector<64x1xi1>, vector<64x1xi32>
    %c7_i32 = arith.constant 7 : i32
    %17 = vector.broadcast %c7_i32 : i32 to vector<64x1xi32>
    %18 = arith.cmpi ne, %16, %17 : vector<64x1xi32>
    %c0_i32_3 = arith.constant 0 : i32
    %19 = vector.broadcast %c0_i32_3 : i32 to vector<64x1xi32>
    %20 = arith.cmpi ne, %16, %19 : vector<64x1xi32>
    %cst = arith.constant 0.000000e+00 : bf16
    %21 = vector.broadcast %cst : bf16 to vector<9x128xbf16>
    %cst_4 = arith.constant 0.000000e+00 : bf16
    %22 = vector.broadcast %cst_4 : bf16 to vector<9x128xbf16>
    %c7 = arith.constant 7 : index
    %c0 = arith.constant 0 : index
    %23 = vector.load %arg8[%c7, %c0] : memref<80x128xbf16, #tpu.memory_space<vmem>>, vector<9x128xbf16>
    tpu.vector_store %arg8[%c7, %c0], %21 {strides = array<i32>} : memref<80x128xbf16, #tpu.memory_space<vmem>>, vector<9x128xbf16>,
    %c7_5 = arith.constant 7 : index
    %c0_6 = arith.constant 0 : index
    %24 = vector.load %arg9[%c7_5, %c0_6] : memref<80x128xbf16, #tpu.memory_space<vmem>>, vector<9x128xbf16>
    tpu.vector_store %arg9[%c7_5, %c0_6], %21 {strides = array<i32>} : memref<80x128xbf16, #tpu.memory_space<vmem>>, vector<9x128xbf16>,
    %c7_7 = arith.constant 7 : index
    %c0_8 = arith.constant 0 : index
    %25 = vector.load %arg10[%c7_7, %c0_8] : memref<89x128xbf16, #tpu.memory_space<vmem>>, vector<9x128xbf16>
    tpu.vector_store %arg10[%c7_7, %c0_8], %22 {strides = array<i32>} : memref<89x128xbf16, #tpu.memory_space<vmem>>, vector<9x128xbf16>,
    %c80 = arith.constant 80 : index
    %c0_9 = arith.constant 0 : index
    %26 = vector.load %arg10[%c80, %c0_9] : memref<89x128xbf16, #tpu.memory_space<vmem>>, vector<9x128xbf16>
    tpu.vector_store %arg10[%c80, %c0_9], %22 {strides = array<i32>} : memref<89x128xbf16, #tpu.memory_space<vmem>>, vector<9x128xbf16>,
    %c7_10 = arith.constant 7 : index
    %c0_11 = arith.constant 0 : index
    %27 = vector.load %arg11[%c7_10, %c0_11] : memref<89x128xbf16, #tpu.memory_space<vmem>>, vector<9x128xbf16>
    tpu.vector_store %arg11[%c7_10, %c0_11], %22 {strides = array<i32>} : memref<89x128xbf16, #tpu.memory_space<vmem>>, vector<9x128xbf16>,
    %c80_12 = arith.constant 80 : index
    %c0_13 = arith.constant 0 : index
    %28 = vector.load %arg11[%c80_12, %c0_13] : memref<89x128xbf16, #tpu.memory_space<vmem>>, vector<9x128xbf16>
    tpu.vector_store %arg11[%c80_12, %c0_13], %22 {strides = array<i32>} : memref<89x128xbf16, #tpu.memory_space<vmem>>, vector<9x128xbf16>,
    %c7_14 = arith.constant 7 : index
    %c0_15 = arith.constant 0 : index
    %29 = vector.load %arg12[%c7_14, %c0_15] : memref<89x128xbf16, #tpu.memory_space<vmem>>, vector<9x128xbf16>
    tpu.vector_store %arg12[%c7_14, %c0_15], %22 {strides = array<i32>} : memref<89x128xbf16, #tpu.memory_space<vmem>>, vector<9x128xbf16>,
    %c80_16 = arith.constant 80 : index
    %c0_17 = arith.constant 0 : index
    %30 = vector.load %arg12[%c80_16, %c0_17] : memref<89x128xbf16, #tpu.memory_space<vmem>>, vector<9x128xbf16>
    tpu.vector_store %arg12[%c80_16, %c0_17], %22 {strides = array<i32>} : memref<89x128xbf16, #tpu.memory_space<vmem>>, vector<9x128xbf16>,
    %c0_18 = arith.constant 0 : index
    %c0_19 = arith.constant 0 : index
    %c0_20 = arith.constant 0 : index
    %31 = vector.load %arg1[%c0_18, %c0_19, %c0_20] : memref<1x64x128xbf16, #tpu.memory_space<vmem>>, vector<1x64x128xbf16>
    %32 = vector.shape_cast %31 : vector<1x64x128xbf16> to vector<64x128xbf16>
    %c0_21 = arith.constant 0 : index
    %c0_22 = arith.constant 0 : index
    %33 = vector.load %arg6[%c0_21, %c0_22] : memref<128x128xbf16, #tpu.memory_space<vmem>>, vector<128x128xbf16>
    %cst_23 = arith.constant dense<0.000000e+00> : vector<64x128xf32>
    %34 = tpu.matmul %32, %33, %cst_23 {dimension_numbers = #tpu.dot_dimension_numbers<[1], [0], [0], [1], [0, 0, 1, 1], [], []>} : vector<64x128xbf16>, vector<128x128xbf16>, vector<64x128xf32> -> vector<64x128xf32>
    %cst_24 = arith.constant 0.000000e+00 : bf16
    %35 = vector.broadcast %cst_24 : bf16 to vector<64x128xbf16>
    %36 = arith.maximumf %32, %35 : vector<64x128xbf16>
    %c16 = arith.constant 16 : index
    %c0_25 = arith.constant 0 : index
    %37 = vector.load %arg8[%c16, %c0_25] : memref<80x128xbf16, #tpu.memory_space<vmem>>, vector<64x128xbf16>
    tpu.vector_store %arg8[%c16, %c0_25], %36 {strides = array<i32>} : memref<80x128xbf16, #tpu.memory_space<vmem>>, vector<64x128xbf16>,
    %c0_i32_26 = arith.constant 0 : i32
    %38 = arith.sitofp %c0_i32_26 : i32 to bf16
    %39 = vector.shape_cast %18 : vector<64x1xi1> to vector<64x1xi1>
    %40 = vector.broadcast %39 : vector<64x1xi1> to vector<64x128xi1>
    %41 = vector.broadcast %38 : bf16 to vector<64x128xbf16>
    %42 = arith.select %40, %36, %41 : vector<64x128xi1>, vector<64x128xbf16>
    %c16_27 = arith.constant 16 : index
    %c0_28 = arith.constant 0 : index
    %43 = vector.load %arg9[%c16_27, %c0_28] : memref<80x128xbf16, #tpu.memory_space<vmem>>, vector<64x128xbf16>
    tpu.vector_store %arg9[%c16_27, %c0_28], %42 {strides = array<i32>} : memref<80x128xbf16, #tpu.memory_space<vmem>>, vector<64x128xbf16>,
    %c7_29 = arith.constant 7 : index
    %c0_30 = arith.constant 0 : index
    %44 = vector.load %arg9[%c7_29, %c0_30] : memref<80x128xbf16, #tpu.memory_space<vmem>>, vector<64x128xbf16>
    %c0_31 = arith.constant 0 : index
    %c0_32 = arith.constant 0 : index
    %c0_33 = arith.constant 0 : index
    %45 = vector.load %arg2[%c0_31, %c0_32, %c0_33] : memref<4x128x128xbf16, #tpu.memory_space<vmem>>, vector<1x128x128xbf16>
    %46 = vector.shape_cast %45 : vector<1x128x128xbf16> to vector<128x128xbf16>
    %cst_34 = arith.constant dense<0.000000e+00> : vector<64x128xf32>
    %47 = tpu.matmul %44, %46, %cst_34 {dimension_numbers = #tpu.dot_dimension_numbers<[1], [0], [0], [1], [0, 0, 1, 1], [], []>} : vector<64x128xbf16>, vector<128x128xbf16>, vector<64x128xf32> -> vector<64x128xf32>
    %c8 = arith.constant 8 : index
    %c0_35 = arith.constant 0 : index
    %48 = vector.load %arg8[%c8, %c0_35] : memref<80x128xbf16, #tpu.memory_space<vmem>>, vector<64x128xbf16>
    %c1 = arith.constant 1 : index
    %c0_36 = arith.constant 0 : index
    %c0_37 = arith.constant 0 : index
    %49 = vector.load %arg2[%c1, %c0_36, %c0_37] : memref<4x128x128xbf16, #tpu.memory_space<vmem>>, vector<1x128x128xbf16>
    %50 = vector.shape_cast %49 : vector<1x128x128xbf16> to vector<128x128xbf16>
    %cst_38 = arith.constant dense<0.000000e+00> : vector<64x128xf32>
    %51 = tpu.matmul %48, %50, %cst_38 {dimension_numbers = #tpu.dot_dimension_numbers<[1], [0], [0], [1], [0, 0, 1, 1], [], []>} : vector<64x128xbf16>, vector<128x128xbf16>, vector<64x128xf32> -> vector<64x128xf32>
    %52 = arith.addf %47, %51 : vector<64x128xf32>
    %c15 = arith.constant 15 : index
    %c0_39 = arith.constant 0 : index
    %53 = vector.load %arg9[%c15, %c0_39] : memref<80x128xbf16, #tpu.memory_space<vmem>>, vector<64x128xbf16>
    %c2 = arith.constant 2 : index
    %c0_40 = arith.constant 0 : index
    %c0_41 = arith.constant 0 : index
    %54 = vector.load %arg2[%c2, %c0_40, %c0_41] : memref<4x128x128xbf16, #tpu.memory_space<vmem>>, vector<1x128x128xbf16>
    %55 = vector.shape_cast %54 : vector<1x128x128xbf16> to vector<128x128xbf16>
    %cst_42 = arith.constant dense<0.000000e+00> : vector<64x128xf32>
    %56 = tpu.matmul %53, %55, %cst_42 {dimension_numbers = #tpu.dot_dimension_numbers<[1], [0], [0], [1], [0, 0, 1, 1], [], []>} : vector<64x128xbf16>, vector<128x128xbf16>, vector<64x128xf32> -> vector<64x128xf32>
    %57 = arith.addf %52, %56 : vector<64x128xf32>
    %c3 = arith.constant 3 : index
    %c0_43 = arith.constant 0 : index
    %c0_44 = arith.constant 0 : index
    %58 = vector.load %arg2[%c3, %c0_43, %c0_44] : memref<4x128x128xbf16, #tpu.memory_space<vmem>>, vector<1x128x128xbf16>
    %59 = vector.shape_cast %58 : vector<1x128x128xbf16> to vector<128x128xbf16>
    %cst_45 = arith.constant dense<0.000000e+00> : vector<64x128xf32>
    %60 = tpu.matmul %36, %59, %cst_45 {dimension_numbers = #tpu.dot_dimension_numbers<[1], [0], [0], [1], [0, 0, 1, 1], [], []>} : vector<64x128xbf16>, vector<128x128xbf16>, vector<64x128xf32> -> vector<64x128xf32>
    %61 = arith.addf %57, %60 : vector<64x128xf32>
    %c0_46 = arith.constant 0 : index
    %c0_47 = arith.constant 0 : index
    %62 = vector.load %arg3[%c0_46, %c0_47] : memref<1x128xf32, #tpu.memory_space<vmem>>, vector<1x128xf32>
    %63 = vector.broadcast %62 : vector<1x128xf32> to vector<64x128xf32>
    %64 = arith.addf %61, %63 : vector<64x128xf32>
    %cst_48 = arith.constant 0.000000e+00 : f32
    %65 = vector.broadcast %cst_48 : f32 to vector<64x128xf32>
    %66 = arith.maximumf %64, %65 : vector<64x128xf32>
    %67 = arith.truncf %66 : vector<64x128xf32> to vector<64x128xbf16>
    %c16_49 = arith.constant 16 : index
    %c0_50 = arith.constant 0 : index
    %68 = vector.load %arg10[%c16_49, %c0_50] : memref<89x128xbf16, #tpu.memory_space<vmem>>, vector<64x128xbf16>
    tpu.vector_store %arg10[%c16_49, %c0_50], %67 {strides = array<i32>} : memref<89x128xbf16, #tpu.memory_space<vmem>>, vector<64x128xbf16>,
    %cst_51 = arith.constant 0.000000e+00 : f32
    %69 = vector.shape_cast %18 : vector<64x1xi1> to vector<64x1xi1>
    %70 = vector.broadcast %69 : vector<64x1xi1> to vector<64x128xi1>
    %71 = vector.broadcast %cst_51 : f32 to vector<64x128xf32>
    %72 = arith.select %70, %66, %71 : vector<64x128xi1>, vector<64x128xf32>
    %73 = arith.truncf %72 : vector<64x128xf32> to vector<64x128xbf16>
    %c16_52 = arith.constant 16 : index
    %c0_53 = arith.constant 0 : index
    %74 = vector.load %arg11[%c16_52, %c0_53] : memref<89x128xbf16, #tpu.memory_space<vmem>>, vector<64x128xbf16>
    tpu.vector_store %arg11[%c16_52, %c0_53], %73 {strides = array<i32>} : memref<89x128xbf16, #tpu.memory_space<vmem>>, vector<64x128xbf16>,
    %cst_54 = arith.constant 0.000000e+00 : f32
    %75 = vector.shape_cast %20 : vector<64x1xi1> to vector<64x1xi1>
    %76 = vector.broadcast %75 : vector<64x1xi1> to vector<64x128xi1>
    %77 = vector.broadcast %cst_54 : f32 to vector<64x128xf32>
    %78 = arith.select %76, %66, %77 : vector<64x128xi1>, vector<64x128xf32>
    %79 = arith.truncf %78 : vector<64x128xf32> to vector<64x128xbf16>
    %c16_55 = arith.constant 16 : index
    %c0_56 = arith.constant 0 : index
    %80 = vector.load %arg12[%c16_55, %c0_56] : memref<89x128xbf16, #tpu.memory_space<vmem>>, vector<64x128xbf16>
    tpu.vector_store %arg12[%c16_55, %c0_56], %79 {strides = array<i32>} : memref<89x128xbf16, #tpu.memory_space<vmem>>, vector<64x128xbf16>,
    %c0_57 = arith.constant 0 : index
    %c0_58 = arith.constant 0 : index
    %81 = vector.load %arg5[%c0_57, %c0_58] : memref<1x128xf32, #tpu.memory_space<vmem>>, vector<1x128xf32>
    %82 = vector.broadcast %81 : vector<1x128xf32> to vector<64x128xf32>
    %83 = arith.addf %34, %82 : vector<64x128xf32>
    %c7_59 = arith.constant 7 : index
    %c0_60 = arith.constant 0 : index
    %84 = vector.load %arg11[%c7_59, %c0_60] : memref<89x128xbf16, #tpu.memory_space<vmem>>, vector<64x128xbf16>
    %c0_61 = arith.constant 0 : index
    %c0_62 = arith.constant 0 : index
    %c0_63 = arith.constant 0 : index
    %85 = vector.load %arg4[%c0_61, %c0_62, %c0_63] : memref<9x128x128xbf16, #tpu.memory_space<vmem>>, vector<1x128x128xbf16>
    %86 = vector.shape_cast %85 : vector<1x128x128xbf16> to vector<128x128xbf16>
    %cst_64 = arith.constant dense<0.000000e+00> : vector<64x128xf32>
    %87 = tpu.matmul %84, %86, %cst_64 {dimension_numbers = #tpu.dot_dimension_numbers<[1], [0], [0], [1], [0, 0, 1, 1], [], []>} : vector<64x128xbf16>, vector<128x128xbf16>, vector<64x128xf32> -> vector<64x128xf32>
    %88 = arith.addf %83, %87 : vector<64x128xf32>
    %c8_65 = arith.constant 8 : index
    %c0_66 = arith.constant 0 : index
    %89 = vector.load %arg10[%c8_65, %c0_66] : memref<89x128xbf16, #tpu.memory_space<vmem>>, vector<64x128xbf16>
    %c1_67 = arith.constant 1 : index
    %c0_68 = arith.constant 0 : index
    %c0_69 = arith.constant 0 : index
    %90 = vector.load %arg4[%c1_67, %c0_68, %c0_69] : memref<9x128x128xbf16, #tpu.memory_space<vmem>>, vector<1x128x128xbf16>
    %91 = vector.shape_cast %90 : vector<1x128x128xbf16> to vector<128x128xbf16>
    %cst_70 = arith.constant dense<0.000000e+00> : vector<64x128xf32>
    %92 = tpu.matmul %89, %91, %cst_70 {dimension_numbers = #tpu.dot_dimension_numbers<[1], [0], [0], [1], [0, 0, 1, 1], [], []>} : vector<64x128xbf16>, vector<128x128xbf16>, vector<64x128xf32> -> vector<64x128xf32>
    %93 = arith.addf %88, %92 : vector<64x128xf32>
    %c9 = arith.constant 9 : index
    %c0_71 = arith.constant 0 : index
    %94 = vector.load %arg12[%c9, %c0_71] : memref<89x128xbf16, #tpu.memory_space<vmem>>, vector<64x128xbf16>
    %c2_72 = arith.constant 2 : index
    %c0_73 = arith.constant 0 : index
    %c0_74 = arith.constant 0 : index
    %95 = vector.load %arg4[%c2_72, %c0_73, %c0_74] : memref<9x128x128xbf16, #tpu.memory_space<vmem>>, vector<1x128x128xbf16>
    %96 = vector.shape_cast %95 : vector<1x128x128xbf16> to vector<128x128xbf16>
    %cst_75 = arith.constant dense<0.000000e+00> : vector<64x128xf32>
    %97 = tpu.matmul %94, %96, %cst_75 {dimension_numbers = #tpu.dot_dimension_numbers<[1], [0], [0], [1], [0, 0, 1, 1], [], []>} : vector<64x128xbf16>, vector<128x128xbf16>, vector<64x128xf32> -> vector<64x128xf32>
    %98 = arith.addf %93, %97 : vector<64x128xf32>
    %c15_76 = arith.constant 15 : index
    %c0_77 = arith.constant 0 : index
    %99 = vector.load %arg11[%c15_76, %c0_77] : memref<89x128xbf16, #tpu.memory_space<vmem>>, vector<64x128xbf16>
    %c3_78 = arith.constant 3 : index
    %c0_79 = arith.constant 0 : index
    %c0_80 = arith.constant 0 : index
    %100 = vector.load %arg4[%c3_78, %c0_79, %c0_80] : memref<9x128x128xbf16, #tpu.memory_space<vmem>>, vector<1x128x128xbf16>
    %101 = vector.shape_cast %100 : vector<1x128x128xbf16> to vector<128x128xbf16>
    %cst_81 = arith.constant dense<0.000000e+00> : vector<64x128xf32>
    %102 = tpu.matmul %99, %101, %cst_81 {dimension_numbers = #tpu.dot_dimension_numbers<[1], [0], [0], [1], [0, 0, 1, 1], [], []>} : vector<64x128xbf16>, vector<128x128xbf16>, vector<64x128xf32> -> vector<64x128xf32>
    %103 = arith.addf %98, %102 : vector<64x128xf32>
    %c4 = arith.constant 4 : index
    %c0_82 = arith.constant 0 : index
    %c0_83 = arith.constant 0 : index
    %104 = vector.load %arg4[%c4, %c0_82, %c0_83] : memref<9x128x128xbf16, #tpu.memory_space<vmem>>, vector<1x128x128xbf16>
    %105 = vector.shape_cast %104 : vector<1x128x128xbf16> to vector<128x128xbf16>
    %cst_84 = arith.constant dense<0.000000e+00> : vector<64x128xf32>
    %106 = tpu.matmul %67, %105, %cst_84 {dimension_numbers = #tpu.dot_dimension_numbers<[1], [0], [0], [1], [0, 0, 1, 1], [], []>} : vector<64x128xbf16>, vector<128x128xbf16>, vector<64x128xf32> -> vector<64x128xf32>
    %107 = arith.addf %103, %106 : vector<64x128xf32>
    %c17 = arith.constant 17 : index
    %c0_85 = arith.constant 0 : index
    %108 = vector.load %arg12[%c17, %c0_85] : memref<89x128xbf16, #tpu.memory_space<vmem>>, vector<64x128xbf16>
    %c5 = arith.constant 5 : index
    %c0_86 = arith.constant 0 : index
    %c0_87 = arith.constant 0 : index
    %109 = vector.load %arg4[%c5, %c0_86, %c0_87] : memref<9x128x128xbf16, #tpu.memory_space<vmem>>, vector<1x128x128xbf16>
    %110 = vector.shape_cast %109 : vector<1x128x128xbf16> to vector<128x128xbf16>
    %cst_88 = arith.constant dense<0.000000e+00> : vector<64x128xf32>
    %111 = tpu.matmul %108, %110, %cst_88 {dimension_numbers = #tpu.dot_dimension_numbers<[1], [0], [0], [1], [0, 0, 1, 1], [], []>} : vector<64x128xbf16>, vector<128x128xbf16>, vector<64x128xf32> -> vector<64x128xf32>
    %112 = arith.addf %107, %111 : vector<64x128xf32>
    %c23 = arith.constant 23 : index
    %c0_89 = arith.constant 0 : index
    %113 = vector.load %arg11[%c23, %c0_89] : memref<89x128xbf16, #tpu.memory_space<vmem>>, vector<64x128xbf16>
    %c6 = arith.constant 6 : index
    %c0_90 = arith.constant 0 : index
    %c0_91 = arith.constant 0 : index
    %114 = vector.load %arg4[%c6, %c0_90, %c0_91] : memref<9x128x128xbf16, #tpu.memory_space<vmem>>, vector<1x128x128xbf16>
    %115 = vector.shape_cast %114 : vector<1x128x128xbf16> to vector<128x128xbf16>
    %cst_92 = arith.constant dense<0.000000e+00> : vector<64x128xf32>
    %116 = tpu.matmul %113, %115, %cst_92 {dimension_numbers = #tpu.dot_dimension_numbers<[1], [0], [0], [1], [0, 0, 1, 1], [], []>} : vector<64x128xbf16>, vector<128x128xbf16>, vector<64x128xf32> -> vector<64x128xf32>
    %117 = arith.addf %112, %116 : vector<64x128xf32>
    %c24 = arith.constant 24 : index
    %c0_93 = arith.constant 0 : index
    %118 = vector.load %arg10[%c24, %c0_93] : memref<89x128xbf16, #tpu.memory_space<vmem>>, vector<64x128xbf16>
    %c7_94 = arith.constant 7 : index
    %c0_95 = arith.constant 0 : index
    %c0_96 = arith.constant 0 : index
    %119 = vector.load %arg4[%c7_94, %c0_95, %c0_96] : memref<9x128x128xbf16, #tpu.memory_space<vmem>>, vector<1x128x128xbf16>
    %120 = vector.shape_cast %119 : vector<1x128x128xbf16> to vector<128x128xbf16>
    %cst_97 = arith.constant dense<0.000000e+00> : vector<64x128xf32>
    %121 = tpu.matmul %118, %120, %cst_97 {dimension_numbers = #tpu.dot_dimension_numbers<[1], [0], [0], [1], [0, 0, 1, 1], [], []>} : vector<64x128xbf16>, vector<128x128xbf16>, vector<64x128xf32> -> vector<64x128xf32>
    %122 = arith.addf %117, %121 : vector<64x128xf32>
    %c25 = arith.constant 25 : index
    %c0_98 = arith.constant 0 : index
    %123 = vector.load %arg12[%c25, %c0_98] : memref<89x128xbf16, #tpu.memory_space<vmem>>, vector<64x128xbf16>
    %c8_99 = arith.constant 8 : index
    %c0_100 = arith.constant 0 : index
    %c0_101 = arith.constant 0 : index
    %124 = vector.load %arg4[%c8_99, %c0_100, %c0_101] : memref<9x128x128xbf16, #tpu.memory_space<vmem>>, vector<1x128x128xbf16>
    %125 = vector.shape_cast %124 : vector<1x128x128xbf16> to vector<128x128xbf16>
    %cst_102 = arith.constant dense<0.000000e+00> : vector<64x128xf32>
    %126 = tpu.matmul %123, %125, %cst_102 {dimension_numbers = #tpu.dot_dimension_numbers<[1], [0], [0], [1], [0, 0, 1, 1], [], []>} : vector<64x128xbf16>, vector<128x128xbf16>, vector<64x128xf32> -> vector<64x128xf32>
    %127 = arith.addf %122, %126 : vector<64x128xf32>
    %128 = arith.truncf %127 : vector<64x128xf32> to vector<64x128xbf16>
    %c0_103 = arith.constant 0 : index
    %c0_104 = arith.constant 0 : index
    %c0_105 = arith.constant 0 : index
    %129 = vector.load %arg7[%c0_103, %c0_104, %c0_105] : memref<1x64x128xbf16, #tpu.memory_space<vmem>>, vector<1x64x128xbf16>
    %130 = vector.shape_cast %129 : vector<1x64x128xbf16> to vector<64x128xbf16>
    %131 = vector.shape_cast %128 : vector<64x128xbf16> to vector<1x64x128xbf16>
    tpu.vector_store %arg7[%c0_103, %c0_104, %c0_105], %131 {strides = array<i32>} : memref<1x64x128xbf16, #tpu.memory_space<vmem>>, vector<1x64x128xbf16>,
    return
  }
  func.func @transform_0(%arg0: i32) -> (i32, i32, i32) {
    %c0_i32 = arith.constant 0 : i32
    %c0_i32_0 = arith.constant 0 : i32
    %c0_i32_1 = arith.constant 0 : i32
    return %arg0, %c0_i32, %c0_i32_0 : i32, i32, i32
  }
  func.func @transform_1(%arg0: i32) -> (i32, i32, i32) {
    %c0_i32 = arith.constant 0 : i32
    %c0_i32_0 = arith.constant 0 : i32
    %c0_i32_1 = arith.constant 0 : i32
    %c0_i32_2 = arith.constant 0 : i32
    return %c0_i32, %c0_i32_0, %c0_i32_1 : i32, i32, i32
  }
  func.func @transform_2(%arg0: i32) -> (i32, i32) {
    %c0_i32 = arith.constant 0 : i32
    %c0_i32_0 = arith.constant 0 : i32
    %c0_i32_1 = arith.constant 0 : i32
    return %c0_i32, %c0_i32_0 : i32, i32
  }
  func.func @transform_3(%arg0: i32) -> (i32, i32, i32) {
    %c0_i32 = arith.constant 0 : i32
    %c0_i32_0 = arith.constant 0 : i32
    %c0_i32_1 = arith.constant 0 : i32
    %c0_i32_2 = arith.constant 0 : i32
    return %c0_i32, %c0_i32_0, %c0_i32_1 : i32, i32, i32
  }
  func.func @transform_4(%arg0: i32) -> (i32, i32) {
    %c0_i32 = arith.constant 0 : i32
    %c0_i32_0 = arith.constant 0 : i32
    %c0_i32_1 = arith.constant 0 : i32
    return %c0_i32, %c0_i32_0 : i32, i32
  }
  func.func @transform_5(%arg0: i32) -> (i32, i32) {
    %c0_i32 = arith.constant 0 : i32
    %c0_i32_0 = arith.constant 0 : i32
    %c0_i32_1 = arith.constant 0 : i32
    return %c0_i32, %c0_i32_0 : i32, i32
  }
  func.func @transform_6(%arg0: i32) -> (i32, i32, i32) {
    %c0_i32 = arith.constant 0 : i32
    %c0_i32_0 = arith.constant 0 : i32
    %c0_i32_1 = arith.constant 0 : i32
    return %arg0, %c0_i32, %c0_i32_0 : i32, i32, i32
  }
}

</mosaic_0001>

<bundles_post_ra>
// kernel: tpu_custom_call.1
= control target key start
LH: loop header
LB: loop body
LE: loop exit
PB: predicated region body
PF: predicated region fallthrough
CT: control target
= control target key end

     0   :  { %11 = vsyncpa [#allocation8], 0  ;;  %s5737_s0 = inlined_call_operand.hbm [shape: bf16[2,64,128], index: 0, kind: input, shape index: {}]   ;;  %s5738_s1 = inlined_call_operand.hbm [shape: bf16[4,128,128], index: 1, kind: input, shape index: {}]   ;;  %s5739_s2 = inlined_call_operand.hbm [shape: f32[1,128], index: 2, kind: input, shape index: {}]   ;;  %s5740_s3 = inlined_call_operand.hbm [shape: bf16[9,128,128], index: 3, kind: input, shape index: {}]   ;;  %s5741_s4 = inlined_call_operand.hbm [shape: f32[1,128], index: 4, kind: input, shape index: {}]   ;;  %s5742_s5 = inlined_call_operand.hbm [shape: bf16[128,128], index: 5, kind: input, shape index: {}]   ;;  %s5743_s6 = inlined_call_operand.hbm [shape: bf16[2,64,128], index: 6, kind: output, shape index: {}]  }
   0x1   :  { %13 = vsyncpa [#allocation8 + $0x1], 0 }
   0x2   :  { %14 = vsyncpa [#allocation11], 0 }
   0x3   :  { %15 = vsyncpa [#allocation14], 0 }
   0x4   :  { %16 = vsyncpa [#allocation17], 0 }
   0x5   :  { %17 = vsyncpa [#allocation9], 0 }
   0x6   :  { %19 = vsyncpa [#allocation9 + $0x1], 0  ;;  %s5025_s21 = smov 0   ;;  %s5027_s22 = smov 0  }
   0x7   :  { %s5029_s23 = smov 0   ;;  %s5031_s24 = smov 0  }
   0x8 LB: > { %s4978_s25 = smov [#allocation10]   ;;  %s5046_s27 = sadd.s32 4294967295, %s4976_s24   ;;  %s4976_s24 = sphi %s5031_s24, %s5812_s24   ;;  %s4972_s23 = sphi %s5029_s23, %s5811_s23   ;;  %s4968_s22 = sphi %s5027_s22, %s5810_s22   ;;  %s4964_s21 = sphi %s5025_s21, %s5809_s21  }
   0x9   : > { %s199_s26 = sshll.u32 %s4978_s25, 4  ;;  %p3516_p0 = scmp.ge.s32.totalorder %s4976_s24, 1  ;;  %s5051_s26 = int_to_ptr.vmem [resolvable:$true] %s199_s26 }
   0xa   : > { %p5744_p1 = scmp.eq.s32.totalorder %s5046_s27, 0  ;;  %p187_p2 = scmp.lt.s32.totalorder %s4976_s24, 3 }
   0xb   : > { %s4979_s29 = smov [#allocation13]   ;;  %s4980_s8 = smov [#allocation12]  }
   0xc   : > { %p5053_p3 = pnand %p3516_p0, %p187_p2  ;;  %s223_s30 = sshll.u32 %s4979_s29, 4  ;;  %s5066_s30 = int_to_ptr.vmem [resolvable:$true] %s223_s30 }
   0xd   : > { %s213_s9 = sshll.u32 %s4980_s8, 4  ;;  %s4728_s12 = scalar_lea.hbm %s5738_s1, 4096  ;;  %s5068_s9 = int_to_ptr.vmem [resolvable:$true] %s213_s9 }
   0xe   : > { %s5752_s28 = scalar_select %p5053_p3, 1, 0 }
   0xf   : > { %p4496_p5 = pneg %p5053_p3  ;;  %p4729_p7 = scmp.ne.s32.totalorder %s5738_s1, %s4728_s12 }
  0x10   : > { %p4735_p11 = scmp.lt.u32.totalorder %s4728_s12, %s5738_s1 }
  0x11   : > { %p5062_p6 = pnand %p4496_p5, %p5744_p1 }
  0x13   : > { %p5078_p8 = pneg %p5062_p6 }
  0x15   : > { %p4731_p9 = pnand %p5078_p8, %p4729_p7 }
  0x17   : > { %p4732_p10 = pneg %p4731_p9 }
  0x19   : > { %p4737_p12 = pnand %p4735_p11, %p4732_p10 }
  0x1b   : > { %4740 = shalt.err (!%p4737_p12)
}
  0x1c   : > { %s4741_s18 = scalar_lea.vmem %s5051_s26, 4096  ;;  %p4749_p5 = scmp.lt.s32.totalorder %s5051_s26, %s5051_s26 }
  0x1d   : > { %p4742_p13 = scmp.ne.s32.totalorder %s5051_s26, %s4741_s18  ;;  %p4750_p4 = scmp.lt.s32.totalorder %s4741_s18, %s4741_s18 }
  0x1f   : > { %p4744_p0 = pnand %p4742_p13, %p5078_p8  ;;  %p4751_p7 = por %p4750_p4, %p4749_p5 }
  0x21   : > { %p4745_p2 = pneg %p4744_p0 }
  0x23   : > { %p4752_p9 = pnand %p4751_p7, %p4745_p2 }
  0x25   : > { %4755 = shalt.err (!%p4752_p9)
}
  0x26   : > { %s4981_s19 = smov 64   ;;  %s4982_s20 = smov 4  }
  0x27   : > { %4499 = dma.hbm_to_vmem [thread:$0]  (!%p5062_p6), %s5738_s1, 4096, %s5051_s26, [#allocation11], %s4981_s19, %s4981_s19, %s4982_s20  }
  0x28   : > { %s4756_s11 = scalar_lea.hbm %s5740_s3, 9216 }
  0x29   : > { %p4757_p4 = scmp.ne.s32.totalorder %s5740_s3, %s4756_s11  ;;  %p4763_p12 = scmp.lt.u32.totalorder %s4756_s11, %s5740_s3 }
  0x2b   : > { %p4759_p10 = pnand %p4757_p4, %p5078_p8 }
  0x2d   : > { %p4760_p11 = pneg %p4759_p10 }
  0x2f   : > { %p4765_p13 = pnand %p4763_p12, %p4760_p11 }
  0x31   : > { %4768 = shalt.err (!%p4765_p13)
}
  0x32   : > { %s4769_s26 = scalar_lea.vmem %s5066_s30, 9216  ;;  %p4777_p7 = scmp.lt.s32.totalorder %s5066_s30, %s5066_s30 }
  0x33   : > { %p4770_p0 = scmp.ne.s32.totalorder %s5066_s30, %s4769_s26  ;;  %p4778_p9 = scmp.lt.s32.totalorder %s4769_s26, %s4769_s26 }
  0x35   : > { %p4772_p2 = pnand %p4770_p0, %p5078_p8  ;;  %p4779_p4 = por %p4778_p9, %p4777_p7 }
  0x37   : > { %p4773_p5 = pneg %p4772_p2 }
  0x39   : > { %p4780_p10 = pnand %p4779_p4, %p4773_p5 }
  0x3b   : > { %4783 = shalt.err (!%p4780_p10)
}
  0x3c   : > { %4505 = dma.hbm_to_vmem [thread:$0]  (!%p5062_p6), %s5740_s3, 9216, %s5066_s30, [#allocation14], %s4981_s19, %s4981_s19, %s4982_s20  }
  0x3d   : > { %s4784_s8 = scalar_lea.hbm %s5739_s2, 16 }
  0x3e   : > { %p4785_p11 = scmp.ne.s32.totalorder %s5739_s2, %s4784_s8  ;;  %p4791_p0 = scmp.lt.u32.totalorder %s4784_s8, %s5739_s2 }
  0x40   : > { %p4787_p12 = pnand %p4785_p11, %p5078_p8 }
  0x42   : > { %p4788_p13 = pneg %p4787_p12 }
  0x44   : > { %p4793_p2 = pnand %p4791_p0, %p4788_p13 }
  0x46   : > { %4796 = shalt.err (!%p4793_p2)
}
  0x47   : > { %s4797_s30 = scalar_lea.vmem %s5068_s9, 16  ;;  %s4804_s14 = scalar_lea.vmem %s5068_s9, 32 }
  0x48   : > { %p4798_p5 = scmp.ne.s32.totalorder %s5068_s9, %s4797_s30  ;;  %p4805_p4 = scmp.lt.s32.totalorder %s5068_s9, %s5068_s9 }
  0x49   : > { %p4806_p10 = scmp.lt.s32.totalorder %s4804_s14, %s4797_s30 }
  0x4a   : > { %p4800_p7 = pnand %p4798_p5, %p5078_p8 }
  0x4b   : > { %p4807_p11 = por %p4806_p10, %p4805_p4 }
  0x4c   : > { %p4801_p9 = pneg %p4800_p7 }
  0x4e   : > { %p4808_p12 = pnand %p4807_p11, %p4801_p9 }
  0x50   : > { %4811 = shalt.err (!%p4808_p12)
}
  0x51   : > { %4502 = dma.hbm_to_vmem [thread:$0]  (!%p5062_p6), %s5739_s2, 16, %s5068_s9, [#allocation11]  }
  0x52   : > { %s4983_s17 = smov [#allocation15]   ;;  %s4984_s25 = smov [#allocation16]  }
  0x53   : > { %s237_s18 = sshll.u32 %s4983_s17, 4  ;;  %s247_s29 = sshll.u32 %s4984_s25, 4  ;;  %s238_s18 = int_to_ptr.vmem [resolvable:$true] %s237_s18  ;;  %s248_s29 = int_to_ptr.vmem [resolvable:$true] %s247_s29 }
  0x54   : > { %s4812_s11 = scalar_lea.hbm %s5741_s4, 16 }
  0x55   : > { %p4813_p13 = scmp.ne.s32.totalorder %s5741_s4, %s4812_s11  ;;  %p4819_p5 = scmp.lt.u32.totalorder %s4812_s11, %s5741_s4 }
  0x57   : > { %p4815_p0 = pnand %p4813_p13, %p5078_p8 }
  0x59   : > { %p4816_p2 = pneg %p4815_p0 }
  0x5b   : > { %p4821_p7 = pnand %p4819_p5, %p4816_p2 }
  0x5d   : > { %4824 = shalt.err (!%p4821_p7)
}
  0x5e   : > { %s4825_s9 = scalar_lea.vmem %s238_s18, 16  ;;  %s4832_s16 = scalar_lea.vmem %s238_s18, 32 }
  0x5f   : > { %p4826_p9 = scmp.ne.s32.totalorder %s238_s18, %s4825_s9  ;;  %p4833_p11 = scmp.lt.s32.totalorder %s238_s18, %s238_s18 }
  0x60   : > { %p4834_p12 = scmp.lt.s32.totalorder %s4832_s16, %s4825_s9 }
  0x61   : > { %p4828_p4 = pnand %p4826_p9, %p5078_p8 }
  0x62   : > { %p4835_p1 = por %p4834_p12, %p4833_p11 }
  0x63   : > { %p4829_p10 = pneg %p4828_p4 }
  0x65   : > { %p4836_p3 = pnand %p4835_p1, %p4829_p10 }
  0x67   : > { %4839 = shalt.err (!%p4836_p3)
}
  0x68   : > { %4508 = dma.hbm_to_vmem [thread:$0]  (!%p5062_p6), %s5741_s4, 16, %s238_s18, [#allocation14]  }
  0x69   : > { %s4840_s10 = scalar_lea.hbm %s5742_s5, 1024 }
  0x6a   : > { %p4841_p13 = scmp.ne.s32.totalorder %s5742_s5, %s4840_s10  ;;  %p4847_p3 = scmp.lt.u32.totalorder %s4840_s10, %s5742_s5 }
  0x6c   : > { %p4843_p0 = pnand %p4841_p13, %p5078_p8 }
  0x6e   : > { %p4844_p1 = pneg %p4843_p0 }
  0x70   : > { %p4849_p2 = pnand %p4847_p3, %p4844_p1 }
  0x72   : > { %4852 = shalt.err (!%p4849_p2)
}
  0x73   : > { %s4853_s14 = scalar_lea.vmem %s248_s29, 1024  ;;  %p4861_p4 = scmp.lt.s32.totalorder %s248_s29, %s248_s29 }
  0x74   : > { %p4854_p5 = scmp.ne.s32.totalorder %s248_s29, %s4853_s14  ;;  %p4862_p10 = scmp.lt.s32.totalorder %s4853_s14, %s4853_s14 }
  0x76   : > { %p4856_p7 = pnand %p4854_p5, %p5078_p8  ;;  %p4863_p11 = por %p4862_p10, %p4861_p4 }
  0x78   : > { %p4857_p9 = pneg %p4856_p7 }
  0x7a   : > { %p4864_p12 = pnand %p4863_p11, %p4857_p9 }
  0x7c   : > { %4867 = shalt.err (!%p4864_p12)
}
  0x7d   : > { %4511 = dma.hbm_to_vmem [thread:$0]  (!%p5062_p6), %s5742_s5, 1024, %s248_s29, [#allocation17], %s4981_s19, %s4981_s19, %s4982_s20  }
  0x7e   : > { %s3515_s7 = sadd.s32 4294967294, %s4976_s24   ;;  %s5193_s15 = sadd.s32 1, %s4976_s24  }
  0x7f   : > { %s32_s16 = sadd.s32 1, %s4972_s23  ;;  %s29_s26 = ssub.s32 %s4976_s24, %s5193_s15 }
  0x80   : > { %p39_p8 = scmp.ne.s32.totalorder %s4972_s23, %s4968_s22  ;;  %p30_p13 = scmp.eq.s32.totalorder %s29_s26, 0 }
  0x81   : > { %p40_p0 = scmp.eq.s32.totalorder %s4976_s24, 0  ;;  %p45_p1 = scmp.ne.s32.totalorder %s4968_s22, %s4964_s21 }
  0x82   : > { %p174_p3 = scmp.eq.s32.totalorder %s5046_s27, 1  ;;  %p5755_p5 = scmp.eq.s32.totalorder %s5046_s27, 0 }
  0x83   : > { %s5205_s17 = scalar_select %p30_p13, %s4972_s23, %s32_s16  }
  0x84   : > { %p41_p2 = por %p40_p0, %p39_p8  ;;  %p5209_p7 = por %p5755_p5, %p45_p1 }
  0x85   : > { %p5213_p6 = por %p174_p3, %p39_p8  ;;  %p180_p9 = scmp.eq.s32.totalorder %s3515_s7, 1 }
  0x86   : > { %p4525_p4 = scmp.lt.s32.totalorder %s4976_s24, 2  ;;  %s261_s8 = sand.u32 1, %s4972_s23  }
  0x87   : > { %s5757_s29 = scalar_select %p5213_p6, 1, 0 }
  0x88   : > { %p5219_p10 = por %p180_p9, %p45_p1  ;;  %s3523_s11 = sshll.u32 %s261_s8, 5 }
  0x89   : > { %s3735_s12 = sshll.u32 %s4976_s24, 9  ;;  %s265_s18 = scalar_lea.vmem [#allocation7], %s3523_s11 }
  0x8a   : > { %s5758_s10 = scalar_select %p5219_p10, 1, 0 }
  0x8b   : > { %s5227_s14 = scalar_lea.hbm %s5737_s0, %s3735_s12  ;;  %s272_s9 = sshll.u32 %s265_s18, 4  ;;  %s5233_s9 = int_to_ptr.vmem [resolvable:$true] %s272_s9 }
  0x8c   : > { %p5229_p11 = pnand %p4525_p4, %p41_p2  ;;  %s5235_s16 = scalar_lea.sflag [#allocation8], %s261_s8 }
  0x8d   : > { %s4868_s26 = scalar_lea.hbm %s5227_s14, 512  ;;  %s4873_s13 = scalar_lea.hbm %s5737_s0, 1024 }
  0x8e   : > { %p4869_p12 = scmp.ne.s32.totalorder %s5227_s14, %s4868_s26  ;;  %p4870_p8 = pneg %p5229_p11 }
  0x8f   : > { %p4874_p1 = scmp.lt.u32.totalorder %s5227_s14, %s5737_s0  ;;  %p4875_p3 = scmp.lt.u32.totalorder %s4873_s13, %s4868_s26 }
  0x90   : > { %p4871_p13 = pnand %p4870_p8, %p4869_p12  ;;  %p4877_p5 = scmp.lt.u32.totalorder %s4868_s26, %s5227_s14 }
  0x91   : > { %p4876_p2 = por %p4875_p3, %p4874_p1 }
  0x92   : > { %p4872_p0 = pneg %p4871_p13 }
  0x93   : > { %p4878_p9 = por %p4877_p5, %p4876_p2 }
  0x95   : > { %p4879_p4 = pnand %p4878_p9, %p4872_p0 }
  0x97   : > { %4882 = shalt.err (!%p4879_p4)
}
  0x98   : > { %s4883_s8 = scalar_lea.vmem %s5233_s9, 512  ;;  %s4985_s11 = smov [#allocation7]  }
  0x99   : > { %p4884_p12 = scmp.ne.s32.totalorder %s5233_s9, %s4883_s8  ;;  %s4888_s12 = sshll.u32 %s4985_s11, 4  ;;  %s4889_s12 = int_to_ptr.vmem [resolvable:$false] %s4888_s12 }
  0x9a   : > { %s4890_s30 = scalar_lea.vmem %s4889_s12, 1024  ;;  %p4891_p6 = scmp.lt.s32.totalorder %s5233_s9, %s4889_s12 }
  0x9b   : > { %p4886_p13 = pnand %p4884_p12, %p4870_p8  ;;  %p4892_p1 = scmp.lt.s32.totalorder %s4890_s30, %s4883_s8 }
  0x9d   : > { %p4887_p10 = pneg %p4886_p13  ;;  %p4893_p3 = por %p4892_p1, %p4891_p6 }
  0x9f   : > { %p4894_p2 = pnand %p4893_p3, %p4887_p10 }
  0xa1   : > { %4897 = shalt.err (!%p4894_p2)
}
  0xa2   : > { %4515 = dma.hbm_to_vmem [thread:$0]  (!%p5229_p11), %s5227_s14, 512, %s5233_s9, %s5235_s16, %s4981_s19, %s4981_s19, %s4982_s20  }
  0xa3   : > { %p5760_p8 = scmp.ne.s32.totalorder %s5752_s28, 0 }
  0xa4   : > { %s5269_s26 = sand.u32 (!%p5760_p8), 1, %s4968_s22  }
  0xa5   : > { %284 = sbr.rel (%p5760_p8) target bundleno = 991 (0x3df), region = 44  ;;  %s3527_s13 = sshll.u32 (!%p5760_p8), %s5269_s26, 5 }
  0xa6   : > { %s287_s18 = scalar_lea.sflag (!%p5760_p8), [#allocation8], %s5269_s26  ;;  %s5275_s7 = scalar_lea.vmem (!%p5760_p8), [#allocation7], %s3527_s13 }
  0xac   : > { %4943 = dma.done.wait (%p5209_p7), %s287_s18, 512  }
  0xad   : > { %4945 = vsyncadd (%p5209_p7), %s287_s18, 4294966784  ;;  %p5761_p6 = scmp.eq.s32.totalorder %s5046_s27, 0 }
  0xaf   : > { %4947 = dma.done.wait (%p5761_p6), [#allocation11], 4112   ;;  %p5762_p10 = pmov %p5761_p6 }
  0xb0   : > { %p5763_p11 = pmov %p5761_p6 }
  0xb1   : > { %4949 = vsyncadd (%p5762_p10), [#allocation11], 4294963184 }
  0xb2   : > { %4951 = dma.done.wait (%p5763_p11), [#allocation14], 9232   ;;  %p5764_p0 = pmov %p5761_p6 }
  0xb4   : > { %4953 = vsyncadd (%p5764_p0), [#allocation14], 4294958064  ;;  %p5765_p5 = pmov %p5764_p0 }
  0xb5   : > { %p5766_p9 = pmov %p5764_p0 }
  0xb6   : > { %4955 = dma.done.wait (%p5765_p5), [#allocation17], 1024  }
  0xb7   : > { %4957 = vsyncadd (%p5766_p9), [#allocation17], 4294966272  ;;  %v340_v0 = vlaneseq  ;;  %v4986_v2 = vmov 0   ;;  %vm461_vm0 = vcmask 1047555   ;;  %vm462_vm1 = vsmask.f32 7950 }
  0xb8   : > { %475 = vst [vmem:[#allocation4 + $0x4] sm:$0xf] %v4986_v2  ;;  %476 = vst [vmem:[#allocation4 + $0x28] sm:$0xf] %v4986_v2  ;;  %vm470_vm2 = vcmask 1043459   ;;  %v4574_v6 = vld [vmem:[#allocation10 + $0x40] sm:$0xff]  }
  0xb9   : > { %v5293_v1 = vshrl.u32 %v340_v0, 7  ;;  %486 = vst [vmem:[#allocation5 + $0x4] sm:$0xf] %v4986_v2  ;;  %487 = vst [vmem:[#allocation5 + $0x28] sm:$0xf] %v4986_v2  ;;  %v4575_v8 = vld [vmem:[#allocation10 + $0x48] sm:$0xff]   ;;  %4032 = vmatprep.subr.bf16.mxu0 %v4574_v6 }
  0xba   : > { %494 = vst [vmem:[#allocation6 + $0x4] sm:$0xf] %v4986_v2  ;;  %495 = vst [vmem:[#allocation6 + $0x28] sm:$0xf] %v4986_v2  ;;  %4033 = vmatpush3.bf16.msra.mxu0 %v4574_v6  ;;  %v4576_v14 = vld [vmem:[#allocation10 + $0x50] sm:$0xff]   ;;  %v4577_v22 = vld [vmem:[#allocation10 + $0x58] sm:$0xff]  }
  0xbb   : > { %v5302_v3 = vadd.s32 8, %v5293_v1  ;;  %v353_v4 = vand.u32 7, %v5293_v1  ;;  %v5306_v5 = vadd.s32 16, %v5293_v1  ;;  %v5309_v7 = vadd.s32 24, %v5293_v1  ;;  %4034 = vmatprep.subr.bf16.mxu0 %v4575_v8  ;;  %vm5333_vm4 = vmand %vm461_vm0, %vm462_vm1  ;;  %v464_v24 = vld [vmem:[#allocation2] sm:$0xf8] }
  0xbc   : > { %v5312_v9 = vadd.s32 32, %v5293_v1  ;;  %v5316_v11 = vadd.s32 40, %v5293_v1  ;;  %v5320_v13 = vadd.s32 48, %v5293_v1  ;;  %v5323_v15 = vadd.s32 56, %v5293_v1  ;;  %vm5346_vm6 = vmand %vm470_vm2, %vm462_vm1  ;;  %v467_v25 = vld [vmem:[#allocation3] sm:$0xf8] }
  0xbd   : > { %v5751_v10 = vand.u32 7, %v5302_v3  ;;  %v367_v12 = vand.u32 7, %v5306_v5  ;;  %vm5327_vm3 = vcmp.ne.s32.totalorder %v353_v4, 7  ;;  %v374_v18 = vand.u32 7, %v5309_v7  ;;  %v472_v26 = vld [vmem:[#allocation4] sm:$0x8] }
  0xbe   : > { %v5749_v21 = vand.u32 7, %v5312_v9  ;;  %4035 = vmatpush3.bf16.msra.mxu0 %v4575_v8  ;;  %v465_v27 = vsel %vm5333_vm4, 0, %v464_v24  ;;  %v468_v28 = vsel %vm5333_vm4, 0, %v467_v25  ;;  %v473_v29 = vsel %vm5346_vm6, 0, %v472_v26  ;;  %v483_v30 = vld [vmem:[#allocation5] sm:$0x8]  ;;  %vm575_vm8 = vmpackc.low %vm5327_vm3, %vm5327_vm3 }
  0xbf   : > { %vm5340_vm5 = vcmp.ne.s32.totalorder %v5751_v10, 7  ;;  %vm5353_vm7 = vcmp.ne.s32.totalorder %v367_v12, 7  ;;  %4036 = vmatprep.subr.bf16.mxu0 %v4576_v14  ;;  %vm5368_vm9 = vcmp.ne.s32.totalorder %v374_v18, 7  ;;  %v4578_v32 = vld [vmem:[#allocation10 + $0x60] sm:$0xff]   ;;  %466 = vst [vmem:[#allocation2] sm:$0xf8] %v465_v27 }
  0xc0   : > { %474 = vst [vmem:[#allocation4] sm:$0x8] %v473_v29  ;;  %v484_v33 = vsel %vm5346_vm6, 0, %v483_v30  ;;  %v491_v34 = vld [vmem:[#allocation6] sm:$0x8]  ;;  %vm576_vm10 = vmpackc.low %vm5340_vm5, %vm5340_vm5  ;;  %v5747_v36 = vand.u32 7, %v5316_v11 }
  0xc1   : > { %v5375_v35 = vld [vmem:[%s5275_s7] sm:$0xf]  ;;  %469 = vst [vmem:[#allocation3] sm:$0xf8] %v468_v28  ;;  %v492_v37 = vsel %vm5346_vm6, 0, %v491_v34  ;;  %vm577_vm11 = vmpackc.low %vm5353_vm7, %vm5353_vm7  ;;  %vm5393_vm12 = vcmp.ne.s32.totalorder %v5749_v21, 7 }
  0xc2   : > { %4037 = vmatpush3.bf16.msra.mxu0 %v4576_v14  ;;  %v5384_v38 = vld [vmem:[%s5275_s7 + $0x4] sm:$0xf]  ;;  %v523_v39 = vmax.bf16 %v4986_v2, %v5375_v35  ;;  %485 = vst [vmem:[#allocation5] sm:$0x8] %v484_v33  ;;  %493 = vst [vmem:[#allocation6] sm:$0x8] %v492_v37 }
  0xc3   : > { %4038 = vmatprep.subr.bf16.mxu0 %v4577_v22  ;;  %v524_v41 = vmax.bf16 %v4986_v2, %v5384_v38  ;;  %v5400_v42 = vld [vmem:[%s5275_s7 + $0x8] sm:$0xf]  ;;  %v5403_v43 = vld [vmem:[%s5275_s7 + $0xc] sm:$0xf]  ;;  %vm578_vm13 = vmpackc.low %vm5368_vm9, %vm5368_vm9  ;;  %v5750_v47 = vand.u32 7, %v5320_v13  ;;  %v5748_v50 = vand.u32 7, %v5323_v15 }
  0xc4   : > { %v583_v44 = vsel %vm575_vm8, %v523_v39, 0  ;;  %v525_v45 = vmax.bf16 %v4986_v2, %v5400_v42  ;;  %v526_v46 = vmax.bf16 %v4986_v2, %v5403_v43  ;;  %v4579_v51 = vld [vmem:[#allocation10 + $0x68] sm:$0xff]   ;;  %vm5440_vm14 = vcmp.ne.s32.totalorder %v5747_v36, 7  ;;  %vm579_vm0 = vmpackc.low %vm5393_vm12, %vm5393_vm12  ;;  %v5454_v62 = vld [vmem:[%s5275_s7 + $0x10] sm:$0xf]  ;;  %s338_s28 = scalar_lea.vmem [#allocation18], %s3527_s13 }
  0xc5   : > { %v5418_v48 = vcombine.low %v523_v39, %v524_v41  ;;  %v584_v49 = vsel %vm576_vm10, %v524_v41, 0  ;;  %vm667_vm15 = vcmask 1043456   ;;  %vm5449_vm1 = vcmp.ne.s32.totalorder %v5750_v47, 7  ;;  %v5457_v63 = vld [vmem:[%s5275_s7 + $0x14] sm:$0xf]  ;;  %vm580_vm2 = vmpackc.low %vm5440_vm14, %vm5440_vm14  ;;  %v4581_v30 = vld [vmem:[#allocation10 + $0x78] sm:$0xff]  }
  0xc6   : > { %4039 = vmatpush3.bf16.msra.mxu0 %v4577_v22  ;;  %v5426_v52 = vcombine.low %v583_v44, %v584_v49  ;;  %v5428_v53 = vcombine.low %v525_v45, %v526_v46  ;;  %v585_v54 = vsel %vm577_vm11, %v525_v45, 0  ;;  %v586_v55 = vsel %vm578_vm13, %v526_v46, 0  ;;  %v640_v59 = vld [vmem:[#allocation2] sm:$0xf0]  ;;  %v4580_v6 = vld [vmem:[#allocation10 + $0x70] sm:$0xff]   ;;  %vm581_vm6 = vmpackc.low %vm5449_vm1, %vm5449_vm1  ;;  %s3394_s19 = sshll.u32 %s338_s28, 4  ;;  %s5688_s19 = int_to_ptr.vmem [resolvable:$true] %s3394_s19 }
  0xc7   : > { %4040 = vmatprep.subr.bf16.mxu0 %v4578_v32  ;;  %v669_v56 = vrot.slane %v5418_v48, 4  ;;  %v5436_v57 = vcombine.low %v585_v54, %v586_v55  ;;  %v668_v60 = vrot.slane %v640_v59, 4  ;;  %vm5464_vm4 = vcmp.ne.s32.totalorder %v5748_v50, 7  ;;  %v5474_v20 = vld [vmem:[%s5275_s7 + $0x18] sm:$0xf]  ;;  %v4582_v39 = vld [vmem:[#allocation10] sm:$0xff]  }
  0xc8   : > { %v527_v14 = vmax.bf16 %v4986_v2, %v5454_v62  ;;  %v528_v17 = vmax.bf16 %v4986_v2, %v5457_v63  ;;  %v5477_v22 = vld [vmem:[%s5275_s7 + $0x1c] sm:$0xf]  ;;  %v529_v27 = vmax.bf16 %v4986_v2, %v5474_v20  ;;  %vm582_vm8 = vmpackc.low %vm5464_vm4, %vm5464_vm4  ;;  %v619_v37 = vld [vmem:[#allocation3] sm:$0xf8]  ;;  %vm477_vm10 = vcmask 1040384   ;;  %s3768_s20 = sshll.u32 %s5046_s27, 9 }
  0xc9   : > { %v670_v8 = vsel %vm667_vm15, %v668_v60, %v669_v56  ;;  %v530_v28 = vmax.bf16 %v4986_v2, %v5477_v22  ;;  %v671_v41 = vrot.slane %v5428_v53, 4  ;;  %v804_v44 = vshrl.u32 %v5426_v52, 16  ;;  %v4583_v54 = vld [vmem:[#allocation10 + $0x8] sm:$0xff]   ;;  %v4588_v36 = vld [vmem:[#allocation10 + $0x30] sm:$0xff]   ;;  %v4590_v21 = vld [vmem:[#allocation10 + $0x80] sm:$0xff]   ;;  %s5693_s9 = scalar_lea.hbm %s5743_s6, %s3768_s20  ;;  %s3381_s16 = scalar_lea.sflag [#allocation9], %s5269_s26 }
  0xca   : > { %4041 = vmatpush3.bf16.msra.mxu0 %v4578_v32  ;;  %4048 = vmatprep.mubr.bf16.mxu0 %v670_v8  ;;  %v5482_v24 = vcombine.low %v527_v14, %v528_v17  ;;  %v587_v25 = vsel %vm579_vm0, %v527_v14, 0  ;;  %v588_v26 = vsel %vm580_vm2, %v528_v17, 0  ;;  %v589_v32 = vsel %vm581_vm6, %v529_v27, 0  ;;  %s4898_s8 = scalar_lea.vmem %s5688_s19, 512  ;;  %p5806_p4 = scmp.ne.s32.totalorder %s5757_s29, 0 }
  0xcb   : > { %4042 = vmatprep.subr.bf16.mxu0 %v4579_v51  ;;  %v5496_v29 = vcombine.low %v587_v25, %v588_v26  ;;  %v5498_v33 = vcombine.low %v529_v27, %v530_v28  ;;  %v590_v34 = vsel %vm582_vm8, %v530_v28, 0  ;;  %v807_v2 = vshll.u32 %v5426_v52, 16  ;;  %v480_v25 = vld [vmem:[#allocation4 + $0x2c] sm:$0x1]  ;;  %v488_v28 = vld [vmem:[#allocation5 + $0x2c] sm:$0x1]  ;;  %p4899_p7 = scmp.ne.s32.totalorder %s5688_s19, %s4898_s8 }
  0xcc   : > { %v3541_v45 = vcombine.low %v589_v32, %v590_v34  ;;  %v673_v46 = vrot.slane %v5482_v24, 4  ;;  %v796_v49 = vshrl.u32 %v619_v37, 16  ;;  %vm478_vm11 = vsmask.f32 256  ;;  %v4597_v52 = vld [vmem:[#allocation10 + $0xb8] sm:$0xff]   ;;  %s4987_s27 = smov [#allocation18]  }
  0xcd   : > { %558 = vst [vmem:[#allocation2 + $0x20] sm:$0xff] %v5498_v33  ;;  %v672_v55 = vsel %vm667_vm15, %v669_v56, %v671_v41  ;;  %v806_v59 = vrot.slane %v804_v44, 3  ;;  %v809_v60 = vrot.slane %v807_v2, 4  ;;  %vm5512_vm13 = vmand %vm477_vm10, %vm478_vm11  ;;  %v3600_v8 = vcombine.low %v5375_v35, %v5384_v38  ;;  %v4617_v35 = vld [vmem:[#allocation13 + $0x8] sm:$0xff]   ;;  %v4618_v38 = vld [vmem:[#allocation13 + $0x80] sm:$0xff]   ;;  %p4900_p12 = pnand %p4899_p7, %p5806_p4  ;;  %s4902_s11 = sshll.u32 %s4987_s27, 4  ;;  %s4903_s11 = int_to_ptr.vmem [resolvable:$false] %s4902_s11 }
  0xce   : > { %4043 = vmatpush3.bf16.msra.mxu0 %v4579_v51  ;;  %v799_v51 = vshll.u32 %v619_v37, 16  ;;  %618 = vst [vmem:[#allocation3 + $0x20] sm:$0xff] %v3541_v45  ;;  %v674_v14 = vsel %vm667_vm15, %v671_v41, %v673_v46  ;;  %v798_v17 = vrot.slane %v796_v49, 3  ;;  %v3601_v26 = vcombine.low %v5400_v42, %v5403_v43  ;;  %v4584_v49 = vld [vmem:[#allocation10 + $0x10] sm:$0xff]   ;;  %4200 = vmatprep.subr.bf16.mxu1 %v4618_v38  ;;  %v4623_v42 = vld [vmem:[#allocation13 + $0x20] sm:$0xff]   ;;  %v4624_v43 = vld [vmem:[#allocation13 + $0x98] sm:$0xff]   ;;  %p4905_p1 = scmp.lt.s32.totalorder %s5688_s19, %s4903_s11 }
  0xcf   : > { %4044 = vmatprep.subr.bf16.mxu0 %v4580_v6  ;;  %v481_v27 = vsel %vm5512_vm13, 0, %v480_v25  ;;  %v489_v34 = vsel %vm5512_vm13, 0, %v488_v28  ;;  %v810_v25 = vor.u32 %v809_v60, %v806_v59  ;;  %vm794_vm0 = vsmask.f32 4352  ;;  %4201 = vmatpush3.bf16.msra.mxu1 %v4618_v38  ;;  %p4901_p13 = pneg %p4900_p12  ;;  %s4904_s12 = scalar_lea.vmem %s4903_s11, 1024 }
  0xd0   : > { %v801_v56 = vrot.slane %v799_v51, 4  ;;  %482 = vst [vmem:[#allocation4 + $0x2c] sm:$0x1] %v481_v27  ;;  %490 = vst [vmem:[#allocation5 + $0x2c] sm:$0x1] %v489_v34  ;;  %v4585_v27 = vld [vmem:[#allocation10 + $0x18] sm:$0xff]   ;;  %p4906_p3 = scmp.lt.s32.totalorder %s4904_s12, %s4898_s8 }
  0xd1   : > { %v4587_v34 = vld [vmem:[#allocation10 + $0x28] sm:$0xff]   ;;  %vm456_vm2 = vcmp.ne.s32.totalorder %v374_v18, 0  ;;  %vm5587_vm6 = vcmp.ne.s32.totalorder %v353_v4, 0 }
  0xd2   : > { %4045 = vmatpush3.bf16.msra.mxu0 %v4580_v6  ;;  %v802_v51 = vor.u32 %v801_v56, %v798_v17  ;;  %v813_v6 = vshrl.u32 %v5436_v57, 16  ;;  %v822_v17 = vshrl.u32 %v5496_v29, 16  ;;  %p4907_p2 = por %p4906_p3, %p4905_p1 }
  0xd3   : > { %4046 = vmatprep.subr.bf16.mxu0 %v4581_v30 }
  0xd4   : > { %v644_v32 = vld [vmem:[#allocation2 + $0x20] sm:$0xf]  ;;  %v811_v28 = vsel %vm794_vm0, %v802_v51, %v810_v25  ;;  %v5532_v60 = vrot.slane %v822_v17, 7  ;;  %p4908_p8 = pnand %p4907_p2, %p4901_p13 }
  0xd5   : > { %v675_v41 = vrot.slane %v644_v32, 4  ;;  %v956_v32 = vld [vmem:[#allocation3] sm:$0x80] }
  0xd6   : > { %4047 = vmatpush3.bf16.msra.mxu0 %v4581_v30  ;;  %v496_v30 = vld [vmem:[#allocation6 + $0x2c] sm:$0x1] }
  0xd7   : > { %4056 = vmatprep.subr.bf16.mxu0 %v4582_v39  ;;  %v497_v37 = vsel %vm5512_vm13, 0, %v496_v30  ;;  %v989_v30 = vshrl.u32 %v3541_v45, 16 }
  0xd8   : > { %498 = vst [vmem:[#allocation6 + $0x2c] sm:$0x1] %v497_v37  ;;  %v825_v37 = vshll.u32 %v5496_v29, 16 }
  0xd9   : > { %4049 = vmatmul.mubr.bf16.vlgmr.msra.gmra.mrb[0].mxu0 %v672_v55  ;;  %v676_v55 = vsel %vm667_vm15, %v673_v46, %v675_v41  ;;  %v991_v59 = vrot.slane %v989_v30, 7  ;;  %v816_v46 = vshll.u32 %v5436_v57, 16  ;;  %v976_v41 = vshrl.u32 %v956_v32, 16  ;;  %v4602_v57 = vld [vmem:[#allocation10 + $0xe0] sm:$0xff]  }
  0xda   : > { %4057 = vmatpush3.bf16.msra.mxu0 %v4582_v39  ;;  %4052 = vmatprep.mubr.bf16.mxu0 %v674_v14  ;;  %v992_v39 = vshll.u32 %v3541_v45, 16  ;;  %v4586_v14 = vld [vmem:[#allocation10 + $0x20] sm:$0xff]   ;;  %v815_v45 = vrot.slane %v813_v6, 3  ;;  %v824_v30 = vrot.slane %v822_v17, 3  ;;  %v827_v50 = vrot.slane %v825_v37, 4  ;;  %v4591_v17 = vld [vmem:[#allocation10 + $0x88] sm:$0xff]  }
  0xdb   : > { %4058 = vmatprep.subr.bf16.mxu0 %v4583_v54  ;;  %v978_v29 = vrot.slane %v976_v41, 7  ;;  %v986_v41 = vor.u32 %v5532_v60, %v825_v37  ;;  %v4605_v37 = vld [vmem:[#allocation10 + $0xf8] sm:$0xff]   ;;  %vm5577_vm15 = vcmp.ne.s32.totalorder %v367_v12, 0 }
  0xdc   : > { %v994_v56 = vor.u32 %v992_v39, %v991_v59  ;;  %v979_v39 = vrot.slane %v804_v44, 7  ;;  %v828_v47 = vor.u32 %v827_v50, %v824_v30  ;;  %v4600_v30 = vld [vmem:[#allocation10 + $0xd0] sm:$0xff]  }
  0xde   : > { %4059 = vmatpush3.bf16.msra.mxu0 %v4583_v54  ;;  %v623_v54 = vld [vmem:[#allocation3 + $0x20] sm:$0xf] }
  0xdf   : > { %4060 = vmatprep.subr.bf16.mxu0 %v4584_v49  ;;  %v831_v51 = vshrl.u32 %v623_v54, 16 }
  0xe1   : > { %4053 = vmatmul.mubr.bf16.gmra.mrb[4].mxu0 %v676_v55  ;;  %v834_v55 = vshll.u32 %v623_v54, 16  ;;  %v833_v32 = vrot.slane %v831_v51, 3  ;;  %v4599_v51 = vld [vmem:[#allocation10 + $0xc8] sm:$0xff]  }
  0xe2   : > { %4061 = vmatpush3.bf16.msra.mxu0 %v4584_v49  ;;  %4072 = vmatprep.mubr.bf16.mxu0 %v811_v28  ;;  %v5537_v49 = vsel %vm478_vm11, %v5532_v60, %v994_v56  ;;  %v818_v28 = vrot.slane %v816_v46, 4  ;;  %v4589_v56 = vld [vmem:[#allocation10 + $0x38] sm:$0xff]   ;;  %v4604_v60 = vld [vmem:[#allocation10 + $0xf0] sm:$0xff]  }
  0xe3   : > { %4062 = vmatprep.subr.bf16.mxu0 %v4585_v27  ;;  %v836_v59 = vrot.slane %v834_v55, 4 }
  0xe4   : > { %v819_v54 = vor.u32 %v818_v28, %v815_v45 }
  0xe6   : > { %4063 = vmatpush3.bf16.msra.mxu0 %v4585_v27  ;;  %v982_v27 = vrot.slane %v813_v6, 7  ;;  %v820_v10 = vsel %vm794_vm0, %v810_v25, %v819_v54  ;;  %v829_v44 = vsel %vm794_vm0, %v819_v54, %v828_v47  ;;  %v4592_v6 = vld [vmem:[#allocation10 + $0x90] sm:$0xff]   ;;  %v4594_v25 = vld [vmem:[#allocation10 + $0xa0] sm:$0xff]  }
  0xe7   : > { %4064 = vmatprep.subr.bf16.mxu0 %v4586_v14  ;;  %v4621_v54 = vld [vmem:[#allocation13 + $0x18] sm:$0xff]  }
  0xe8   : > { %v987_v28 = vsel %vm478_vm11, %v982_v27, %v986_v41  ;;  %v4633_v41 = vld [vmem:[#allocation5] sm:$0xf8]  }
  0xea   : > { %4065 = vmatpush3.bf16.msra.mxu0 %v4586_v14  ;;  %v837_v14 = vor.u32 %v836_v59, %v833_v32  ;;  %v4610_v32 = vld [vmem:[#allocation16 + $0x20] sm:$0xff]   ;;  %v4613_v59 = vld [vmem:[#allocation16 + $0x38] sm:$0xff]  }
  0xeb   : > { %4066 = vmatprep.subr.bf16.mxu0 %v4587_v34 }
  0xec   : > { %v838_v50 = vsel %vm794_vm0, %v828_v47, %v837_v14  ;;  %v983_v47 = vor.u32 %v982_v27, %v816_v46  ;;  %v4603_v46 = vld [vmem:[#allocation10 + $0xe8] sm:$0xff]   ;;  %v4609_v27 = vld [vmem:[#allocation16 + $0x18] sm:$0xff]   ;;  %v4628_v14 = vld [vmem:[#allocation13 + $0x30] sm:$0xff]  }
  0xee   : > { %4067 = vmatpush3.bf16.msra.mxu0 %v4587_v34  ;;  %v980_v34 = vor.u32 %v979_v39, %v807_v2  ;;  %v4598_v2 = vld [vmem:[#allocation10 + $0xc0] sm:$0xff]   ;;  %v984_v55 = vsel %vm478_vm11, %v979_v39, %v983_v47 }
  0xef   : > { %4068 = vmatprep.subr.bf16.mxu0 %v4588_v36  ;;  %v4606_v39 = vld [vmem:[#allocation16] sm:$0xff]  }
  0xf0   : > { %v981_v45 = vsel %vm478_vm11, %v978_v29, %v980_v34  ;;  %v4601_v29 = vld [vmem:[#allocation10 + $0xd8] sm:$0xff]   ;;  %v3603_v34 = vcombine.low %v5474_v20, %v5477_v22  ;;  %v3574_v20 = vld [vmem:[#allocation12] ss:$0 sm:$0xff] }
  0xf2   : > { %4069 = vmatpush3.bf16.msra.mxu0 %v4588_v36  ;;  %v4593_v36 = vld [vmem:[#allocation10 + $0x98] sm:$0xff]  }
  0xf3   : > { %4070 = vmatprep.subr.bf16.mxu0 %v4589_v56 }
  0xf6   : > { %4071 = vmatpush3.bf16.msra.mxu0 %v4589_v56  ;;  %v4615_v56 = vld [vmem:[#allocation13] sm:$0xff]  }
  0xf7   : > { %4080 = vmatprep.subr.bf16.mxu0 %v4590_v21 }
  0xf9   : > { %4073 = vmatmul.mubr.bf16.vlgmr.msra.gmra.mrb[0].mxu0 %v820_v10  ;;  %v4595_v10 = vld [vmem:[#allocation10 + $0xa8] sm:$0xff]  }
  0xfa   : > { %4081 = vmatpush3.bf16.msra.mxu0 %v4590_v21  ;;  %4076 = vmatprep.mubr.bf16.mxu0 %v829_v44  ;;  %v4596_v21 = vld [vmem:[#allocation10 + $0xb0] sm:$0xff]   ;;  %v4626_v44 = vld [vmem:[#allocation13 + $0xa0] sm:$0xff]  }
  0xfb   : > { %4082 = vmatprep.subr.bf16.mxu0 %v4591_v17 }
  0xfe   : > { %4083 = vmatpush3.bf16.msra.mxu0 %v4591_v17  ;;  %v4622_v17 = vld [vmem:[#allocation13 + $0x90] sm:$0xff]  }
  0xff   : > { %4084 = vmatprep.subr.bf16.mxu0 %v4592_v6 }
 0x101   : > { %4077 = vmatmul.mubr.bf16.gmra.mrb[4].mxu0 %v838_v50  ;;  %v4631_v50 = vld [vmem:[#allocation13 + $0x38] sm:$0xff]  }
 0x102   : > { %4085 = vmatpush3.bf16.msra.mxu0 %v4592_v6  ;;  %4096 = vmatprep.mubr.bf16.mxu0 %v981_v45  ;;  %v3602_v6 = vcombine.low %v5454_v62, %v5457_v63  ;;  %v4632_v45 = vld [vmem:[#allocation13 + $0xb0] sm:$0xff]   ;;  %v4639_v62 = vld [vmem:[#allocation13 + $0xb8] sm:$0xff]   ;;  %v5572_v63 = vld [vmem:[#allocation13 + $0xc0] sm:$0xff]  }
 0x103   : > { %4086 = vmatprep.subr.bf16.mxu0 %v4593_v36 }
 0x106   : > { %4087 = vmatpush3.bf16.msra.mxu0 %v4593_v36  ;;  %v4630_v36 = vld [vmem:[#allocation13 + $0xa8] sm:$0xff]  }
 0x107   : > { %4088 = vmatprep.subr.bf16.mxu0 %v4594_v25 }
 0x10a   : > { %4089 = vmatpush3.bf16.msra.mxu0 %v4594_v25  ;;  %v5569_v25 = vld [vmem:[#allocation13 + $0x40] sm:$0xff]  }
 0x10b   : > { %4090 = vmatprep.subr.bf16.mxu0 %v4595_v10 }
 0x10e   : > { %4091 = vmatpush3.bf16.msra.mxu0 %v4595_v10 }
 0x10f   : > { %4092 = vmatprep.subr.bf16.mxu0 %v4596_v21 }
 0x112   : > { %4093 = vmatpush3.bf16.msra.mxu0 %v4596_v21 }
 0x113   : > { %4094 = vmatprep.subr.bf16.mxu0 %v4597_v52 }
 0x116   : > { %4095 = vmatpush3.bf16.msra.mxu0 %v4597_v52 }
 0x117   : > { %4104 = vmatprep.subr.bf16.mxu0 %v4598_v2 }
 0x119   : > { %4097 = vmatmul.mubr.bf16.vlgmr.msra.gmra.mrb[0].mxu0 %v984_v55 }
 0x11a   : > { %4105 = vmatpush3.bf16.msra.mxu0 %v4598_v2  ;;  %4100 = vmatprep.mubr.bf16.mxu0 %v987_v28 }
 0x11b   : > { %4106 = vmatprep.subr.bf16.mxu0 %v4599_v51 }
 0x11e   : > { %4107 = vmatpush3.bf16.msra.mxu0 %v4599_v51 }
 0x11f   : > { %4108 = vmatprep.subr.bf16.mxu0 %v4600_v30 }
 0x121   : > { %4101 = vmatmul.mubr.bf16.gmra.mrb[4].mxu0 %v5537_v49  ;;  %v4607_v49 = vld [vmem:[#allocation16 + $0x8] sm:$0xff]  }
 0x122   : > { %4109 = vmatpush3.bf16.msra.mxu0 %v4600_v30  ;;  %4120 = vmatprep.mubr.bf16.mxu0 %v5418_v48  ;;  %v4608_v48 = vld [vmem:[#allocation16 + $0x10] sm:$0xff]  }
 0x123   : > { %4110 = vmatprep.subr.bf16.mxu0 %v4601_v29 }
 0x126   : > { %4111 = vmatpush3.bf16.msra.mxu0 %v4601_v29 }
 0x127   : > { %4112 = vmatprep.subr.bf16.mxu0 %v4602_v57 }
 0x12a   : > { %4113 = vmatpush3.bf16.msra.mxu0 %v4602_v57 }
 0x12b   : > { %4114 = vmatprep.subr.bf16.mxu0 %v4603_v46 }
 0x12e   : > { %4115 = vmatpush3.bf16.msra.mxu0 %v4603_v46  ;;  %v5793_v46 = vand.u32 7, %v5302_v3 }
 0x12f   : > { %4116 = vmatprep.subr.bf16.mxu0 %v4604_v60 }
 0x130   : > { %vm5593_vm8 = vcmp.ne.s32.totalorder %v5793_v46, 0 }
 0x132   : > { %4117 = vmatpush3.bf16.msra.mxu0 %v4604_v60 }
 0x133   : > { %4118 = vmatprep.subr.bf16.mxu0 %v4605_v37 }
 0x136   : > { %4119 = vmatpush3.bf16.msra.mxu0 %v4605_v37  ;;  %v1627_v37 = vshrl.u32 %v4633_v41, 16 }
 0x137   : > { %4128 = vmatprep.subr.bf16.mxu0 %v4606_v39 }
 0x139   : > { %4121 = vmatmul.mubr.bf16.vlgmr.msra.gmra.mrb[0].mxu0 %v5428_v53  ;;  %v4611_v53 = vld [vmem:[#allocation16 + $0x28] sm:$0xff]  }
 0x13a   : > { %4124 = vmatprep.mubr.bf16.mxu0 %v5482_v24  ;;  %4129 = vmatpush3.bf16.msra.mxu0 %v4606_v39  ;;  %v4612_v24 = vld [vmem:[#allocation16 + $0x30] sm:$0xff]   ;;  %v1630_v39 = vshll.u32 %v4633_v41, 16 }
 0x13b   : > { %4130 = vmatprep.subr.bf16.mxu0 %v4607_v49 }
 0x13e   : > { %4131 = vmatpush3.bf16.msra.mxu0 %v4607_v49 }
 0x13f   : > { %4132 = vmatprep.subr.bf16.mxu0 %v4608_v48 }
 0x141   : > { %4125 = vmatmul.mubr.bf16.gmra.mrb[4].mxu0 %v5498_v33  ;;  %v4619_v33 = vld [vmem:[#allocation13 + $0x10] sm:$0xff]  }
 0x142   : > { %4133 = vmatpush3.bf16.msra.mxu0 %v4608_v48  ;;  %4144 = vmatprep.mubr.bf16.mxu0 %v3600_v8  ;;  %v4620_v8 = vld [vmem:[#allocation13 + $0x88] sm:$0xff]  }
 0x143   : > { %4134 = vmatprep.subr.bf16.mxu0 %v4609_v27  ;;  %4202 = vmatprep.subr.bf16.mxu1 %v4620_v8 }
 0x144   : > { %4203 = vmatpush3.bf16.msra.mxu1 %v4620_v8 }
 0x145   : > { %4204 = vmatprep.subr.bf16.mxu1 %v4622_v17 }
 0x146   : > { %4135 = vmatpush3.bf16.msra.mxu0 %v4609_v27 }
 0x147   : > { %4136 = vmatprep.subr.bf16.mxu0 %v4610_v32 }
 0x148   : > { %4205 = vmatpush3.bf16.msra.mxu1 %v4622_v17 }
 0x149   : > { %4206 = vmatprep.subr.bf16.mxu1 %v4624_v43 }
 0x14a   : > { %4137 = vmatpush3.bf16.msra.mxu0 %v4610_v32 }
 0x14b   : > { %4138 = vmatprep.subr.bf16.mxu0 %v4611_v53 }
 0x14c   : > { %4207 = vmatpush3.bf16.msra.mxu1 %v4624_v43  ;;  %v5799_v43 = vand.u32 7, %v5312_v9 }
 0x14d   : > { %4208 = vmatprep.subr.bf16.mxu1 %v4626_v44 }
 0x14e   : > { %4139 = vmatpush3.bf16.msra.mxu0 %v4611_v53 }
 0x14f   : > { %4140 = vmatprep.subr.bf16.mxu0 %v4612_v24 }
 0x150   : > { %4209 = vmatpush3.bf16.msra.mxu1 %v4626_v44 }
 0x151   : > { %4210 = vmatprep.subr.bf16.mxu1 %v4630_v36 }
 0x152   : > { %4141 = vmatpush3.bf16.msra.mxu0 %v4612_v24 }
 0x153   : > { %4142 = vmatprep.subr.bf16.mxu0 %v4613_v59 }
 0x154   : > { %4211 = vmatpush3.bf16.msra.mxu1 %v4630_v36 }
 0x155   : > { %4212 = vmatprep.subr.bf16.mxu1 %v4632_v45 }
 0x156   : > { %4143 = vmatpush3.bf16.msra.mxu0 %v4613_v59 }
 0x157   : > { %4152 = vmatprep.subr.bf16.mxu0 %v4615_v56 }
 0x158   : > { %4213 = vmatpush3.bf16.msra.mxu1 %v4632_v45  ;;  %v1632_v45 = vrot.slane %v1630_v39, 4 }
 0x159   : > { %4145 = vmatmul.mubr.bf16.vlgmr.msra.gmra.mrb[8].mxu0 %v3601_v26  ;;  %v4625_v26 = vld [vmem:[#allocation13 + $0x28] sm:$0xff]   ;;  %4214 = vmatprep.subr.bf16.mxu1 %v4639_v62 }
 0x15a   : > { %4153 = vmatpush3.bf16.msra.mxu0 %v4615_v56  ;;  %4148 = vmatprep.mubr.bf16.mxu0 %v3602_v6  ;;  %v5802_v6 = vand.u32 7, %v5323_v15 }
 0x15b   : > { %4154 = vmatprep.subr.bf16.mxu0 %v4617_v35 }
 0x15c   : > { %4215 = vmatpush3.bf16.msra.mxu1 %v4639_v62 }
 0x15d   : > { %4224 = vmatprep.subr.bf16.mxu1 %v5572_v63 }
 0x15e   : > { %4155 = vmatpush3.bf16.msra.mxu0 %v4617_v35 }
 0x15f   : > { %4156 = vmatprep.subr.bf16.mxu0 %v4619_v33 }
 0x161   : > { %4149 = vmatmul.mubr.bf16.gmra.mrb[12].mxu0 %v3603_v34  ;;  %v5803_v34 = vand.u32 7, %v5316_v11 }
 0x162   : > { %4157 = vmatpush3.bf16.msra.mxu0 %v4619_v33  ;;  %v5796_v33 = vand.u32 7, %v5320_v13 }
 0x163   : > { %4158 = vmatprep.subr.bf16.mxu0 %v4621_v54 }
 0x166   : > { %4159 = vmatpush3.bf16.msra.mxu0 %v4621_v54 }
 0x167   : > { %4160 = vmatprep.subr.bf16.mxu0 %v4623_v42 }
 0x16a   : > { %4161 = vmatpush3.bf16.msra.mxu0 %v4623_v42 }
 0x16b   : > { %4162 = vmatprep.subr.bf16.mxu0 %v4625_v26 }
 0x16e   : > { %4163 = vmatpush3.bf16.msra.mxu0 %v4625_v26  ;;  %v4644_v26 = vld [vmem:[#allocation13 + $0x50] sm:$0xff]  }
 0x16f   : > { %4164 = vmatprep.subr.bf16.mxu0 %v4628_v14 }
 0x172   : > { %4165 = vmatpush3.bf16.msra.mxu0 %v4628_v14 }
 0x173   : > { %4166 = vmatprep.subr.bf16.mxu0 %v4631_v50 }
 0x176   : > { %4167 = vmatpush3.bf16.msra.mxu0 %v4631_v50  ;;  %v1629_v50 = vrot.slane %v1627_v37, 3 }
 0x177   : > { %4176 = vmatprep.subr.bf16.mxu0 %v5569_v25 }
 0x20c   : > { %v4122_v22 = vpop.f32.mrb[0].mxu0 }
 0x20d   : > { %v1268_v10 = vadd.f32 %v4122_v22, %v3574_v20  ;;  %v1220_v21 = vpop.f32.mrb[1].mxu0 }
 0x20e   : > { %v1266_v2 = vadd.f32 %v3574_v20, %v1220_v21  ;;  %v4123_v47 = vpop.f32.mrb[2].mxu0 }
 0x20f   : > { %v1276_v51 = vmax.f32 %v1268_v10, 0.0  ;;  %v1269_v55 = vadd.f32 %v4123_v47, %v3574_v20  ;;  %v1223_v28 = vpop.f32.mrb[3].mxu0 }
 0x210   : > { %v1274_v30 = vmax.f32 %v1266_v2, 0.0  ;;  %v1267_v29 = vadd.f32 %v3574_v20, %v1223_v28 }
 0x211   : > { %v1388_v57 = vsel %vm5577_vm15, %v1276_v51, 0.0  ;;  %v1277_v12 = vmax.f32 %v1269_v55, 0.0  ;;  %v1324_v7 = vsel %vm5353_vm7, %v1276_v51, 0.0  ;;  %vm460_vm7 = vcmp.ne.s32.totalorder %v5802_v6, 0 }
 0x212   : > { %v1275_v18 = vmax.f32 %v1267_v29, 0.0  ;;  %v1322_v1 = vsel %vm5327_vm3, %v1274_v30, 0.0  ;;  %v1386_v24 = vsel %vm5587_vm6, %v1274_v30, 0.0  ;;  %vm5617_vm3 = vcmp.ne.s32.totalorder %v5796_v33, 0 }
 0x213   : > { %v5601_v4 = vpack.c.bf16 %v1277_v12, %v1276_v51  ;;  %v1325_v49 = vsel %vm5368_vm9, %v1277_v12, 0.0  ;;  %v1389_v48 = vsel %vm456_vm2, %v1277_v12, 0.0  ;;  %vm5631_vm9 = vcmp.ne.s32.totalorder %v5803_v34, 0 }
 0x214   : > { %v3797_v3 = vpack.c.bf16 %v1325_v49, %v1324_v7  ;;  %v3817_v27 = vpack.c.bf16 %v1389_v48, %v1388_v57  ;;  %v5605_v32 = vpack.c.bf16 %v1275_v18, %v1274_v30  ;;  %v1323_v23 = vsel %vm5340_vm5, %v1275_v18, 0.0  ;;  %v4126_v53 = vpop.f32.mrb[4].mxu0 }
 0x215   : > { %3850 = vst [vmem:[#allocation4 + $0x10] sm:$0xff] %v5601_v4   ;;  %v3792_v16 = vpack.c.bf16 %v1323_v23, %v1322_v1  ;;  %v1387_v59 = vsel %vm5593_vm8, %v1275_v18, 0.0  ;;  %v1272_v31 = vadd.f32 %v4126_v53, %v3574_v20  ;;  %v1236_v56 = vpop.f32.mrb[5].mxu0  ;;  %vm5623_vm5 = vcmp.ne.s32.totalorder %v5799_v43, 0  ;;  %v4640_v23 = vld [vmem:[#allocation13 + $0x48] sm:$0xff]  }
 0x216   : > { %3854 = vst [vmem:[#allocation5 + $0x10] sm:$0xff] %v3797_v3   ;;  %3858 = vst [vmem:[#allocation6 + $0x10] sm:$0xff] %v3817_v27   ;;  %v3812_v35 = vpack.c.bf16 %v1387_v59, %v1386_v24  ;;  %v1270_v38 = vadd.f32 %v3574_v20, %v1236_v56  ;;  %v4127_v19 = vpop.f32.mrb[6].mxu0  ;;  %v1633_v12 = vor.u32 %v1632_v45, %v1629_v50 }
 0x217   : > { %3849 = vst [vmem:[#allocation4 + $0x8] sm:$0xff] %v5605_v32   ;;  %3853 = vst [vmem:[#allocation5 + $0x8] sm:$0xff] %v3792_v16   ;;  %v1280_v54 = vmax.f32 %v1272_v31, 0.0  ;;  %v1273_v17 = vadd.f32 %v4127_v19, %v3574_v20  ;;  %v1239_v42 = vpop.f32.mrb[7].mxu0 }
 0x218   : > { %3857 = vst [vmem:[#allocation6 + $0x8] sm:$0xff] %v3812_v35   ;;  %v1278_v44 = vmax.f32 %v1270_v38, 0.0  ;;  %v1271_v14 = vadd.f32 %v3574_v20, %v1239_v42 }
 0x219   : > { %v1281_v13 = vmax.f32 %v1273_v17, 0.0  ;;  %v1328_v9 = vsel %vm5449_vm1, %v1280_v54, 0.0  ;;  %v1392_v62 = vsel %vm5617_vm3, %v1280_v54, 0.0 }
 0x21a   : > { %v1326_v15 = vsel %vm5393_vm12, %v1278_v44, 0.0  ;;  %v1279_v22 = vmax.f32 %v1271_v14, 0.0  ;;  %v1390_v20 = vsel %vm5623_vm5, %v1278_v44, 0.0  ;;  %vm2014_vm12 = vsmask.f32 7424 }
 0x21b   : > { %v5643_v11 = vpack.c.bf16 %v1281_v13, %v1280_v54  ;;  %v1329_v10 = vsel %vm5464_vm4, %v1281_v13, 0.0  ;;  %v1393_v21 = vsel %vm460_vm7, %v1281_v13, 0.0 }
 0x21c   : > { %v3807_v52 = vpack.c.bf16 %v1329_v10, %v1328_v9  ;;  %v3827_v2 = vpack.c.bf16 %v1393_v21, %v1392_v62  ;;  %v5647_v61 = vpack.c.bf16 %v1279_v22, %v1278_v44  ;;  %v1327_v47 = vsel %vm5440_vm14, %v1279_v22, 0.0 }
 0x21d   : > { %3852 = vst [vmem:[#allocation4 + $0x20] sm:$0xff] %v5643_v11   ;;  %v3802_v40 = vpack.c.bf16 %v1327_v47, %v1326_v15  ;;  %v1391_v41 = vsel %vm5631_vm9, %v1279_v22, 0.0  ;;  %v4638_v51 = vld [vmem:[#allocation5 + $0x10] sm:$0xff]  }
 0x21e   : > { %3856 = vst [vmem:[#allocation5 + $0x20] sm:$0xff] %v3807_v52   ;;  %3860 = vst [vmem:[#allocation6 + $0x20] sm:$0xff] %v3827_v2   ;;  %v3822_v0 = vpack.c.bf16 %v1391_v41, %v1390_v20  ;;  %v4634_v55 = vld [vmem:[#allocation5 + $0x8] sm:$0xff]   ;;  %v1644_v30 = vshrl.u32 %v4638_v51, 16  ;;  %v1647_v5 = vshll.u32 %v4638_v51, 16 }
 0x21f   : > { %3851 = vst [vmem:[#allocation4 + $0x18] sm:$0xff] %v5647_v61   ;;  %3855 = vst [vmem:[#allocation5 + $0x18] sm:$0xff] %v3802_v40   ;;  %v4636_v28 = vld [vmem:[#allocation6 + $0x4] sm:$0xff]   ;;  %v1635_v29 = vshrl.u32 %v4634_v55, 16  ;;  %v1638_v58 = vshll.u32 %v4634_v55, 16  ;;  %v4637_v57 = vld [vmem:[#allocation6 + $0xc] sm:$0xff]  }
 0x220   : > { %3859 = vst [vmem:[#allocation6 + $0x18] sm:$0xff] %v3822_v0   ;;  %v2018_v46 = vshll.u32 %v4636_v28, 16  ;;  %v1646_v60 = vrot.slane %v1644_v30, 3  ;;  %v2023_v37 = vshll.u32 %v4637_v57, 16  ;;  %v1649_v39 = vrot.slane %v1647_v5, 4  ;;  %v4653_v6 = vld [vmem:[#allocation5 + $0xc] sm:$0xff]  }
 0x221   : > { %v1637_v7 = vrot.slane %v1635_v29, 3  ;;  %v1640_v18 = vrot.slane %v1638_v58, 4  ;;  %v2016_v1 = vshrl.u32 %v4636_v28, 16  ;;  %v4652_v53 = vld [vmem:[#allocation5 + $0x4] sm:$0xf8]   ;;  %v2027_v42 = vshrl.u32 %v4637_v57, 16 }
 0x222   : > { %v2020_v49 = vrot.slane %v2018_v46, 1  ;;  %v2025_v3 = vrot.slane %v2023_v37, 1  ;;  %v1650_v27 = vor.u32 %v1649_v39, %v1646_v60  ;;  %v2226_v14 = vshrl.u32 %v4652_v53, 16  ;;  %v4647_v47 = vld [vmem:[#allocation13 + $0xc8] sm:$0xff]   ;;  %v4649_v40 = vld [vmem:[#allocation13 + $0x58] sm:$0xff]   ;;  %v4650_v29 = vld [vmem:[#allocation13 + $0xd0] sm:$0xff]  }
 0x223   : > { %v1641_v48 = vor.u32 %v1640_v18, %v1637_v7  ;;  %v2229_v21 = vshll.u32 %v4652_v53, 16  ;;  %v2234_v41 = vshrl.u32 %v4653_v6, 16  ;;  %v2237_v5 = vshll.u32 %v4653_v6, 16  ;;  %v4654_v18 = vld [vmem:[#allocation13 + $0x60] sm:$0xff]   ;;  %v4655_v39 = vld [vmem:[#allocation13 + $0xd8] sm:$0xff]  }
 0x224   : > { %v2021_v24 = vor.u32 %v2020_v49, %v2016_v1  ;;  %v2029_v45 = vor.u32 %v2027_v42, %v2025_v3  ;;  %v2228_v55 = vrot.slane %v2226_v14, 3 }
 0x225   : > { %v4646_v16 = vld [vmem:[#allocation5 + $0x20] ss:$0 sps:$4 sm:$0xff]   ;;  %v1642_v59 = vsel %vm794_vm0, %v1633_v12, %v1641_v48  ;;  %v1651_v31 = vsel %vm794_vm0, %v1641_v48, %v1650_v27  ;;  %v4651_v15 = vld [vmem:[#allocation6 + $0x24] ss:$0 sps:$4 sm:$0x11]   ;;  %v2231_v28 = vrot.slane %v2229_v21, 4 }
 0x226   : > { %v4643_v56 = vld [vmem:[#allocation5 + $0x18] sm:$0xff]   ;;  %4168 = vmatprep.mubr.bf16.mxu0 %v1642_v59  ;;  %v2026_v35 = vsel %vm2014_vm12, %v2021_v24, %v2025_v3  ;;  %v1662_v19 = vshrl.u32 %v4646_v16, 16  ;;  %v1665_v17 = vshll.u32 %v4646_v16, 16  ;;  %v2047_v58 = vshll.u32 %v4651_v15, 16  ;;  %v4656_v48 = vld [vmem:[#allocation13 + $0x68] sm:$0xff]   ;;  %v4657_v3 = vld [vmem:[#allocation13 + $0xe0] sm:$0xff]  }
 0x227   : > { %v4642_v38 = vld [vmem:[#allocation6 + $0x14] sm:$0xff]   ;;  %4216 = vmatprep.mubr.bf16.mxu1 %v2026_v35  ;;  %4169 = vmatmul.mubr.bf16.vlgmr.msra.gmra.mrb[8].mxu0 %v1651_v31  ;;  %v1653_v33 = vshrl.u32 %v4643_v56, 16  ;;  %v1656_v8 = vshll.u32 %v4643_v56, 16  ;;  %v4645_v54 = vld [vmem:[#allocation6 + $0x1c] sm:$0xff]   ;;  %v2236_v57 = vrot.slane %v2234_v41, 3  ;;  %v4648_v12 = vld [vmem:[#allocation4 + $0x4] sm:$0xff]   ;;  %v2232_v7 = vor.u32 %v2231_v28, %v2228_v55 }
 0x228   : > { %4177 = vmatpush3.bf16.msra.mxu0 %v5569_v25  ;;  %v2031_v43 = vshll.u32 %v4642_v38, 16  ;;  %v1664_v44 = vrot.slane %v1662_v19, 3  ;;  %v2039_v36 = vshll.u32 %v4645_v54, 16  ;;  %v1667_v50 = vrot.slane %v1665_v17, 4  ;;  %v4665_v53 = vld [vmem:[#allocation5 + $0x14] sm:$0xff]   ;;  %v4667_v16 = vld [vmem:[#allocation5 + $0x1c] sm:$0xff]  }
 0x229   : > { %4178 = vmatprep.subr.bf16.mxu0 %v4640_v23  ;;  %v1655_v13 = vrot.slane %v1653_v33, 3  ;;  %v1658_v34 = vrot.slane %v1656_v8, 4  ;;  %v2035_v62 = vshrl.u32 %v4642_v38, 16  ;;  %v2043_v10 = vshrl.u32 %v4645_v54, 16  ;;  %v4660_v24 = vld [vmem:[#allocation13 + $0x78] sm:$0xff]   ;;  %v4661_v59 = vld [vmem:[#allocation13 + $0xf0] sm:$0xff]  }
 0x22a   : > { %v2033_v9 = vrot.slane %v2031_v43, 1  ;;  %v1668_v20 = vor.u32 %v1667_v50, %v1664_v44  ;;  %v2041_v2 = vrot.slane %v2039_v36, 1  ;;  %v2239_v60 = vrot.slane %v2237_v5, 4  ;;  %v4664_v19 = vld [vmem:[#allocation13 + $0xf8] sm:$0xff]   ;;  %v4670_v17 = vld [vmem:[#allocation5 + $0x24] ss:$0 sps:$4 sm:$0xff]  }
 0x22b   : > { %v1659_v22 = vor.u32 %v1658_v34, %v1655_v13  ;;  %v2243_v31 = vshrl.u32 %v4665_v53, 16  ;;  %v2246_v56 = vshll.u32 %v4665_v53, 16  ;;  %v2252_v35 = vshrl.u32 %v4667_v16, 16  ;;  %v4662_v33 = vld [vmem:[#allocation4 + $0xc] sm:$0xff]   ;;  %v4669_v36 = vld [vmem:[#allocation13 + $0x108] sm:$0xff]   ;;  %v4679_v28 = vld [vmem:[#allocation13 + $0x150] sm:$0xff]  }
 0x22c   : > { %4179 = vmatpush3.bf16.msra.mxu0 %v4640_v23  ;;  %v2034_v25 = vsel %vm2014_vm12, %v2029_v45, %v2033_v9  ;;  %v2037_v52 = vor.u32 %v2035_v62, %v2033_v9  ;;  %v2045_v46 = vor.u32 %v2043_v10, %v2041_v2  ;;  %v2240_v37 = vor.u32 %v2239_v60, %v2236_v57  ;;  %v4659_v23 = vld [vmem:[#allocation13 + $0xe8] sm:$0xff]   ;;  %v4666_v44 = vld [vmem:[#allocation13 + $0x100] sm:$0xff]   ;;  %v4672_v10 = vld [vmem:[#allocation13 + $0x118] sm:$0xff]  }
 0x22d   : > { %4217 = vmatmul.mubr.bf16.vlgmr.msra.gmra.mrb[0].mxu1 %v2034_v25  ;;  %v1660_v51 = vsel %vm794_vm0, %v1650_v27, %v1659_v22  ;;  %4180 = vmatprep.subr.bf16.mxu0 %v4644_v26  ;;  %v1669_v0 = vsel %vm794_vm0, %v1659_v22, %v1668_v20  ;;  %v4658_v27 = vld [vmem:[#allocation13 + $0x70] sm:$0xff]   ;;  %v2255_v38 = vshll.u32 %v4667_v16, 16  ;;  %v2245_v8 = vrot.slane %v2243_v31, 3  ;;  %v4673_v25 = vld [vmem:[#allocation13 + $0x120] sm:$0xff]   ;;  %v4682_v5 = vld [vmem:[#allocation13 + $0x158] sm:$0xff]  }
 0x22e   : > { %4225 = vmatpush3.bf16.msra.mxu1 %v5572_v63  ;;  %4172 = vmatprep.mubr.bf16.mxu0 %v1660_v51  ;;  %v2042_v30 = vsel %vm2014_vm12, %v2037_v52, %v2041_v2  ;;  %v2049_v63 = vrot.slane %v2047_v58, 1  ;;  %v2241_v49 = vsel %vm794_vm0, %v2232_v7, %v2240_v37  ;;  %v2248_v54 = vrot.slane %v2246_v56, 4  ;;  %v4668_v15 = vld [vmem:[#allocation4 + $0x1c] sm:$0xff]   ;;  %v4677_v41 = vld [vmem:[#allocation13 + $0x140] sm:$0xff]  }
 0x22f   : > { %4220 = vmatprep.mubr.bf16.mxu1 %v2042_v30  ;;  %4173 = vmatmul.mubr.bf16.gmra.mrb[12].mxu0 %v1669_v0  ;;  %v2254_v42 = vrot.slane %v2252_v35, 3  ;;  %v2257_v43 = vrot.slane %v2255_v38, 4  ;;  %v2261_v14 = vshrl.u32 %v4670_v17, 16  ;;  %v2264_v13 = vshll.u32 %v4670_v17, 16  ;;  %v4671_v22 = vld [vmem:[#allocation13 + $0x110] sm:$0xff]   ;;  %v4674_v52 = vld [vmem:[#allocation13 + $0x128] sm:$0xff]  }
 0x230   : > { %4181 = vmatpush3.bf16.msra.mxu0 %v4644_v26  ;;  %4226 = vmatprep.subr.bf16.mxu1 %v4647_v47  ;;  %v2050_v1 = vsel %vm2014_vm12, %v2045_v46, %v2049_v63  ;;  %v4663_v26 = vld [vmem:[#allocation4 + $0x14] sm:$0xff]   ;;  %v2249_v6 = vor.u32 %v2248_v54, %v2245_v8  ;;  %v4675_v2 = vld [vmem:[#allocation13 + $0x130] sm:$0xff]  }
 0x231   : > { %4192 = vmatprep.mubr.bf16.mxu0 %v4648_v12  ;;  %4182 = vmatprep.subr.bf16.mxu0 %v4649_v40  ;;  %v2258_v34 = vor.u32 %v2257_v43, %v2254_v42  ;;  %v2263_v45 = vrot.slane %v2261_v14, 3  ;;  %v2266_v9 = vrot.slane %v2264_v13, 4  ;;  %v4678_v0 = vld [vmem:[#allocation13 + $0x148] sm:$0xff]   ;;  %v4685_v60 = vld [vmem:[#allocation13 + $0x170] sm:$0xff]  }
 0x232   : > { %4227 = vmatpush3.bf16.msra.mxu1 %v4647_v47  ;;  %v2250_v50 = vsel %vm794_vm0, %v2240_v37, %v2249_v6  ;;  %v4676_v47 = vld [vmem:[#allocation13 + $0x138] sm:$0xff]   ;;  %v4687_v46 = vld [vmem:[#allocation6 + $0x18] sm:$0xff]   ;;  %v4689_v63 = vld [vmem:[#allocation6 + $0x20] sm:$0xff]  }
 0x233   : > { %4228 = vmatprep.subr.bf16.mxu1 %v4650_v29  ;;  %v2259_v62 = vsel %vm794_vm0, %v2249_v6, %v2258_v34  ;;  %v2267_v20 = vor.u32 %v2266_v9, %v2263_v45  ;;  %v2597_v7 = vshll.u32 %v4687_v46, 16  ;;  %v4694_v37 = vld [vmem:[#allocation5 + $0x10] sm:$0xff]   ;;  %v2609_v43 = vshrl.u32 %v4689_v63, 16  ;;  %v4696_v45 = vld [vmem:[#allocation13 + $0x1a0] sm:$0xff]  }
 0x234   : > { %4183 = vmatpush3.bf16.msra.mxu0 %v4649_v40  ;;  %v4680_v40 = vld [vmem:[#allocation6 + $0x8] sm:$0xff]   ;;  %v4690_v35 = vld [vmem:[#allocation13 + $0x188] sm:$0xff]  }
 0x235   : > { %4221 = vmatmul.mubr.bf16.gmra.mrb[4].mxu1 %v2050_v1  ;;  %4184 = vmatprep.subr.bf16.mxu0 %v4654_v18  ;;  %v2268_v21 = vsel %vm794_vm0, %v2258_v34, %v2267_v20  ;;  %v2584_v51 = vshll.u32 %v4680_v40, 16  ;;  %v2582_v30 = vshrl.u32 %v4680_v40, 16  ;;  %v4688_v1 = vld [vmem:[#allocation13 + $0x180] sm:$0xff]   ;;  %v4695_v34 = vld [vmem:[#allocation13 + $0x198] sm:$0xff]   ;;  %v4697_v9 = vld [vmem:[#allocation13 + $0x1a8] sm:$0xff]  }
 0x236   : > { %4229 = vmatpush3.bf16.msra.mxu1 %v4650_v29  ;;  %4240 = vmatprep.mubr.bf16.mxu1 %v2241_v49  ;;  %v2601_v49 = vshrl.u32 %v4687_v46, 16  ;;  %v4704_v40 = vld [vmem:[#allocation5 + $0x28] ss:$0 sps:$4 sm:$0xff]   ;;  %v4707_v46 = vld [vmem:[#allocation13 + $0x1d8] sm:$0xff]  }
 0x237   : > { %4230 = vmatprep.subr.bf16.mxu1 %v4655_v39  ;;  %v2586_v55 = vrot.slane %v2584_v51, 1 }
 0x238   : > { %4185 = vmatpush3.bf16.msra.mxu0 %v4654_v18  ;;  %v4686_v18 = vld [vmem:[#allocation13 + $0x178] sm:$0xff]  }
 0x239   : > { %4186 = vmatprep.subr.bf16.mxu0 %v4656_v48  ;;  %v2587_v58 = vor.u32 %v2586_v55, %v2582_v30  ;;  %v2827_v55 = vshrl.u32 %v4704_v40, 16 }
 0x23a   : > { %4231 = vmatpush3.bf16.msra.mxu1 %v4655_v39  ;;  %v4693_v39 = vld [vmem:[#allocation5 + $0x8] sm:$0xf8]  }
 0x23b   : > { %4232 = vmatprep.subr.bf16.mxu1 %v4657_v3  ;;  %v2795_v16 = vshll.u32 %v4693_v39, 16 }
 0x23c   : > { %4187 = vmatpush3.bf16.msra.mxu0 %v4656_v48  ;;  %v2605_v48 = vshll.u32 %v4689_v63, 16  ;;  %v4709_v63 = vld [vmem:[#allocation13 + $0x1e8] sm:$0xff]  }
 0x23d   : > { %4188 = vmatprep.subr.bf16.mxu0 %v4658_v27  ;;  %v2797_v17 = vrot.slane %v2795_v16, 4 }
 0x23e   : > { %4233 = vmatpush3.bf16.msra.mxu1 %v4657_v3  ;;  %v2607_v56 = vrot.slane %v2605_v48, 1  ;;  %v4712_v48 = vld [vmem:[#allocation4 + $0x14] sm:$0xff]  }
 0x23f   : > { %4234 = vmatprep.subr.bf16.mxu1 %v4659_v23 }
 0x240   : > { %4189 = vmatpush3.bf16.msra.mxu0 %v4658_v27  ;;  %v4691_v27 = vld [vmem:[#allocation6 + $0x28] ss:$0 sps:$4 sm:$0x11]  }
 0x241   : > { %4190 = vmatprep.subr.bf16.mxu0 %v4660_v24 }
 0x242   : > { %4235 = vmatpush3.bf16.msra.mxu1 %v4659_v23  ;;  %v2800_v23 = vshrl.u32 %v4694_v37, 16 }
 0x243   : > { %4236 = vmatprep.subr.bf16.mxu1 %v4661_v59 }
 0x244   : > { %4191 = vmatpush3.bf16.msra.mxu0 %v4660_v24  ;;  %v2792_v24 = vshrl.u32 %v4693_v39, 16  ;;  %v4713_v39 = vld [vmem:[#allocation13 + $0x200] sm:$0xff]  }
 0x246   : > { %4237 = vmatpush3.bf16.msra.mxu1 %v4661_v59  ;;  %v2803_v59 = vshll.u32 %v4694_v37, 16  ;;  %v2794_v54 = vrot.slane %v2792_v24, 3  ;;  %v4710_v37 = vld [vmem:[#allocation13 + $0x1f0] sm:$0xff]  }
 0x247   : > { %4193 = vmatmul.mubr.bf16.vlgmr.msra.gmra.mrb[8].mxu0 %v4662_v33  ;;  %4238 = vmatprep.subr.bf16.mxu1 %v4664_v19  ;;  %v2802_v33 = vrot.slane %v2800_v23, 3  ;;  %v4714_v23 = vld [vmem:[#allocation4 + $0x1c] sm:$0xff]  }
 0x248   : > { %4196 = vmatprep.mubr.bf16.mxu0 %v4663_v26  ;;  %v2805_v42 = vrot.slane %v2803_v59, 4  ;;  %v4692_v26 = vld [vmem:[#allocation13 + $0x190] sm:$0xff]   ;;  %v2798_v14 = vor.u32 %v2797_v17, %v2794_v54 }
 0x249   : > { %v4717_v24 = vld [vmem:[#allocation13 + $0x210] sm:$0xff]  }
 0x24a   : > { %4239 = vmatpush3.bf16.msra.mxu1 %v4664_v19  ;;  %v2613_v19 = vshll.u32 %v4691_v27, 16  ;;  %v2806_v13 = vor.u32 %v2805_v42, %v2802_v33  ;;  %v4721_v33 = vld [vmem:[#allocation13 + $0x220] sm:$0xff]   ;;  %v4725_v54 = vld [vmem:[#allocation6 + $0x1c] sm:$0xff]  }
 0x24b   : > { %4248 = vmatprep.subr.bf16.mxu1 %v4666_v44  ;;  %v4723_v17 = vld [vmem:[#allocation13 + $0x230] sm:$0xff]   ;;  %v3195_v42 = vshll.u32 %v4725_v54, 16 }
 0x24c   : > { %v2615_v6 = vrot.slane %v2613_v19, 1 }
 0x24d   : > { %4241 = vmatmul.mubr.bf16.vlgmr.msra.gmra.mrb[0].mxu1 %v2250_v50  ;;  %v2807_v50 = vsel %vm794_vm0, %v2798_v14, %v2806_v13  ;;  %v3199_v14 = vshrl.u32 %v4725_v54, 16 }
 0x24e   : > { %4244 = vmatprep.mubr.bf16.mxu1 %v2259_v62  ;;  %4249 = vmatpush3.bf16.msra.mxu1 %v4666_v44  ;;  %v2611_v44 = vor.u32 %v2609_v43, %v2607_v56  ;;  %v4700_v62 = vld [vmem:[#allocation5 + $0x18] sm:$0xff]  }
 0x24f   : > { %4197 = vmatmul.mubr.bf16.gmra.mrb[12].mxu0 %v4668_v15  ;;  %4250 = vmatprep.subr.bf16.mxu1 %v4669_v36  ;;  %v4702_v15 = vld [vmem:[#allocation5 + $0x20] sm:$0xff]   ;;  %v2809_v20 = vshrl.u32 %v4700_v62, 16 }
 0x250   : > { %v4724_v43 = vld [vmem:[#allocation13 + $0x238] sm:$0xff]  }
 0x252   : > { %4251 = vmatpush3.bf16.msra.mxu1 %v4669_v36  ;;  %v2616_v36 = vsel %vm2014_vm12, %v2611_v44, %v2615_v6  ;;  %v3197_v44 = vrot.slane %v3195_v42, 1 }
 0x253   : > { %4252 = vmatprep.subr.bf16.mxu1 %v4671_v22 }
 0x255   : > { %4245 = vmatmul.mubr.bf16.gmra.mrb[4].mxu1 %v2268_v21  ;;  %v2818_v21 = vshrl.u32 %v4702_v15, 16 }
 0x256   : > { %4253 = vmatpush3.bf16.msra.mxu1 %v4671_v22  ;;  %4264 = vmatprep.mubr.bf16.mxu1 %v5605_v32  ;;  %v4681_v32 = vld [vmem:[#allocation6 + $0x10] sm:$0xff]   ;;  %v4698_v22 = vld [vmem:[#allocation13 + $0x1b0] sm:$0xff]  }
 0x257   : > { %4254 = vmatprep.subr.bf16.mxu1 %v4672_v10  ;;  %v2589_v29 = vshll.u32 %v4681_v32, 16  ;;  %v2593_v3 = vshrl.u32 %v4681_v32, 16 }
 0x259   : > { %v2591_v57 = vrot.slane %v2589_v29, 1  ;;  %v4703_v29 = vld [vmem:[#allocation13 + $0x1c8] sm:$0xff]  }
 0x25a   : > { %4255 = vmatpush3.bf16.msra.mxu1 %v4672_v10  ;;  %v2812_v10 = vshll.u32 %v4700_v62, 16 }
 0x25b   : > { %4256 = vmatprep.subr.bf16.mxu1 %v4673_v25  ;;  %v2592_v12 = vsel %vm2014_vm12, %v2587_v58, %v2591_v57  ;;  %v2595_v31 = vor.u32 %v2593_v3, %v2591_v57  ;;  %v2829_v57 = vrot.slane %v2827_v55, 3  ;;  %v4715_v3 = vld [vmem:[#allocation13 + $0x208] sm:$0xff]  }
 0x25e   : > { %4257 = vmatpush3.bf16.msra.mxu1 %v4673_v25  ;;  %v2821_v25 = vshll.u32 %v4702_v15, 16 }
 0x25f   : > { %4258 = vmatprep.subr.bf16.mxu1 %v4674_v52 }
 0x260   : > { %v2823_v51 = vrot.slane %v2821_v25, 4 }
 0x262   : > { %4259 = vmatpush3.bf16.msra.mxu1 %v4674_v52  ;;  %v4699_v52 = vld [vmem:[#allocation13 + $0x1b8] sm:$0xff]  }
 0x263   : > { %4260 = vmatprep.subr.bf16.mxu1 %v4675_v2 }
 0x266   : > { %4261 = vmatpush3.bf16.msra.mxu1 %v4675_v2  ;;  %v2811_v2 = vrot.slane %v2809_v20, 3 }
 0x267   : > { %4262 = vmatprep.subr.bf16.mxu1 %v4676_v47 }
 0x26a   : > { %4263 = vmatpush3.bf16.msra.mxu1 %v4676_v47  ;;  %v2814_v47 = vrot.slane %v2812_v10, 4 }
 0x26b   : > { %4272 = vmatprep.subr.bf16.mxu1 %v4677_v41 }
 0x26c   : > { %v2815_v32 = vor.u32 %v2814_v47, %v2811_v2 }
 0x26d   : > { %4265 = vmatmul.mubr.bf16.vlgmr.msra.gmra.mrb[0].mxu1 %v5601_v4  ;;  %v4683_v4 = vld [vmem:[#allocation13 + $0x160] sm:$0xff]  }
 0x26e   : > { %4268 = vmatprep.mubr.bf16.mxu1 %v5647_v61  ;;  %4273 = vmatpush3.bf16.msra.mxu1 %v4677_v41  ;;  %v4684_v61 = vld [vmem:[#allocation13 + $0x168] sm:$0xff]   ;;  %v2820_v41 = vrot.slane %v2818_v21, 3  ;;  %v2816_v58 = vsel %vm794_vm0, %v2806_v13, %v2815_v32 }
 0x26f   : > { %4274 = vmatprep.subr.bf16.mxu1 %v4678_v0 }
 0x270   : > { %v2824_v30 = vor.u32 %v2823_v51, %v2820_v41 }
 0x272   : > { %4275 = vmatpush3.bf16.msra.mxu1 %v4678_v0  ;;  %v4701_v0 = vld [vmem:[#allocation13 + $0x1c0] sm:$0xff]  }
 0x273   : > { %4276 = vmatprep.subr.bf16.mxu1 %v4679_v28 }
 0x275   : > { %4269 = vmatmul.mubr.bf16.gmra.mrb[4].mxu1 %v5643_v11  ;;  %v2599_v11 = vrot.slane %v2597_v7, 1  ;;  %v4706_v7 = vld [vmem:[#allocation4 + $0xc] sm:$0xff]  }
 0x276   : > { %4277 = vmatpush3.bf16.msra.mxu1 %v4679_v28  ;;  %4288 = vmatprep.mubr.bf16.mxu1 %v2592_v12  ;;  %v2830_v28 = vshll.u32 %v4704_v40, 16  ;;  %v2825_v12 = vsel %vm794_vm0, %v2815_v32, %v2824_v30  ;;  %v3599_v32 = vld [vmem:[#allocation15] ss:$0 sm:$0xff] }
 0x277   : > { %4278 = vmatprep.subr.bf16.mxu1 %v4682_v5  ;;  %v2603_v53 = vor.u32 %v2601_v49, %v2599_v11  ;;  %v2600_v38 = vsel %vm2014_vm12, %v2595_v31, %v2599_v11  ;;  %v4711_v11 = vld [vmem:[#allocation13 + $0x1f8] sm:$0xff]   ;;  %v4719_v49 = vld [vmem:[#allocation6 + $0x14] sm:$0xff]  }
 0x278   : > { %v3191_v6 = vshrl.u32 %v4719_v49, 16 }
 0x279   : > { %v2608_v8 = vsel %vm2014_vm12, %v2603_v53, %v2607_v56  ;;  %v3187_v53 = vshll.u32 %v4719_v49, 16  ;;  %v4716_v56 = vld [vmem:[#allocation4 + $0x24] sm:$0xff]  }
 0x27a   : > { %4279 = vmatpush3.bf16.msra.mxu1 %v4682_v5  ;;  %v2832_v5 = vrot.slane %v2830_v28, 4 }
 0x27b   : > { %4280 = vmatprep.subr.bf16.mxu1 %v4683_v4  ;;  %v3189_v31 = vrot.slane %v3187_v53, 1 }
 0x27e   : > { %4281 = vmatpush3.bf16.msra.mxu1 %v4683_v4  ;;  %v4705_v4 = vld [vmem:[#allocation13 + $0x1d0] sm:$0xff]  }
 0x27f   : > { %4282 = vmatprep.subr.bf16.mxu1 %v4684_v61 }
 0x282   : > { %4283 = vmatpush3.bf16.msra.mxu1 %v4684_v61  ;;  %v2833_v61 = vor.u32 %v2832_v5, %v2829_v57 }
 0x283   : > { %4284 = vmatprep.subr.bf16.mxu1 %v4685_v60 }
 0x286   : > { %4285 = vmatpush3.bf16.msra.mxu1 %v4685_v60  ;;  %v2834_v60 = vsel %vm794_vm0, %v2824_v30, %v2833_v61 }
 0x287   : > { %4286 = vmatprep.subr.bf16.mxu1 %v4686_v18 }
 0x28a   : > { %4287 = vmatpush3.bf16.msra.mxu1 %v4686_v18  ;;  %v4708_v18 = vld [vmem:[#allocation13 + $0x1e0] sm:$0xff]  }
 0x28b   : > { %4296 = vmatprep.subr.bf16.mxu1 %v4688_v1 }
 0x28d   : > { %4289 = vmatmul.mubr.bf16.vlgmr.msra.gmra.mrb[0].mxu1 %v2600_v38  ;;  %v4720_v38 = vld [vmem:[#allocation13 + $0x218] sm:$0xff]  }
 0x28e   : > { %4292 = vmatprep.mubr.bf16.mxu1 %v2608_v8  ;;  %4297 = vmatpush3.bf16.msra.mxu1 %v4688_v1  ;;  %v4718_v1 = vld [vmem:[#allocation6 + $0xc] sm:$0xff]   ;;  %v4722_v8 = vld [vmem:[#allocation13 + $0x228] sm:$0xff]  }
 0x28f   : > { %4298 = vmatprep.subr.bf16.mxu1 %v4690_v35  ;;  %v3182_v27 = vshll.u32 %v4718_v1, 16  ;;  %v3180_v59 = vshrl.u32 %v4718_v1, 16 }
 0x291   : > { %v3184_v16 = vrot.slane %v3182_v27, 1 }
 0x292   : > { %4299 = vmatpush3.bf16.msra.mxu1 %v4690_v35 }
 0x293   : > { %4300 = vmatprep.subr.bf16.mxu1 %v4692_v26  ;;  %v3185_v35 = vor.u32 %v3184_v16, %v3180_v59 }
 0x295   : > { %4293 = vmatmul.mubr.bf16.gmra.mrb[4].mxu1 %v2616_v36  ;;  %v3190_v19 = vsel %vm2014_vm12, %v3185_v35, %v3189_v31  ;;  %v4727_v36 = vld [vmem:[#allocation6 + $0x2c] ss:$0 sps:$4 sm:$0x11]  }
 0x296   : > { %4301 = vmatpush3.bf16.msra.mxu1 %v4692_v26  ;;  %4312 = vmatprep.mubr.bf16.mxu1 %v2807_v50  ;;  %v4726_v26 = vld [vmem:[#allocation6 + $0x24] sm:$0xff]   ;;  %v3201_v50 = vor.u32 %v3199_v14, %v3197_v44  ;;  %v3211_v62 = vshll.u32 %v4727_v36, 16 }
 0x297   : > { %4302 = vmatprep.subr.bf16.mxu1 %v4695_v34  ;;  %v3203_v13 = vshll.u32 %v4726_v26, 16 }
 0x298   : > { %v3213_v10 = vrot.slane %v3211_v62, 1 }
 0x29a   : > { %4303 = vmatpush3.bf16.msra.mxu1 %v4695_v34  ;;  %v3193_v34 = vor.u32 %v3191_v6, %v3189_v31 }
 0x29b   : > { %4304 = vmatprep.subr.bf16.mxu1 %v4696_v45 }
 0x29e   : > { %4305 = vmatpush3.bf16.msra.mxu1 %v4696_v45  ;;  %v3205_v45 = vrot.slane %v3203_v13, 1 }
 0x29f   : > { %4306 = vmatprep.subr.bf16.mxu1 %v4697_v9 }
 0x2a0   : > { %v3206_v15 = vsel %vm2014_vm12, %v3201_v50, %v3205_v45 }
 0x2a2   : > { %4307 = vmatpush3.bf16.msra.mxu1 %v4697_v9  ;;  %v3198_v9 = vsel %vm2014_vm12, %v3193_v34, %v3197_v44 }
 0x2a3   : > { %4308 = vmatprep.subr.bf16.mxu1 %v4698_v22 }
 0x2a6   : > { %4309 = vmatpush3.bf16.msra.mxu1 %v4698_v22  ;;  %v3207_v22 = vshrl.u32 %v4726_v26, 16 }
 0x2a7   : > { %4310 = vmatprep.subr.bf16.mxu1 %v4699_v52 }
 0x2a8   : > { %v3209_v20 = vor.u32 %v3207_v22, %v3205_v45 }
 0x2aa   : > { %4311 = vmatpush3.bf16.msra.mxu1 %v4699_v52  ;;  %v3214_v21 = vsel %vm2014_vm12, %v3209_v20, %v3213_v10 }
 0x2ab   : > { %4320 = vmatprep.subr.bf16.mxu1 %v4701_v0 }
 0x2ad   : > { %4313 = vmatmul.mubr.bf16.vlgmr.msra.gmra.mrb[0].mxu1 %v2816_v58 }
 0x2ae   : > { %4316 = vmatprep.mubr.bf16.mxu1 %v2825_v12  ;;  %4321 = vmatpush3.bf16.msra.mxu1 %v4701_v0 }
 0x2af   : > { %4322 = vmatprep.subr.bf16.mxu1 %v4703_v29 }
 0x2b2   : > { %4323 = vmatpush3.bf16.msra.mxu1 %v4703_v29 }
 0x2b3   : > { %4324 = vmatprep.subr.bf16.mxu1 %v4705_v4 }
 0x2b5   : > { %4317 = vmatmul.mubr.bf16.gmra.mrb[4].mxu1 %v2834_v60 }
 0x2b6   : > { %4325 = vmatpush3.bf16.msra.mxu1 %v4705_v4  ;;  %4336 = vmatprep.mubr.bf16.mxu1 %v4706_v7 }
 0x2b7   : > { %4326 = vmatprep.subr.bf16.mxu1 %v4707_v46 }
 0x2ba   : > { %4327 = vmatpush3.bf16.msra.mxu1 %v4707_v46 }
 0x2bb   : > { %4328 = vmatprep.subr.bf16.mxu1 %v4708_v18 }
 0x2be   : > { %4329 = vmatpush3.bf16.msra.mxu1 %v4708_v18 }
 0x2bf   : > { %4330 = vmatprep.subr.bf16.mxu1 %v4709_v63 }
 0x2c2   : > { %4331 = vmatpush3.bf16.msra.mxu1 %v4709_v63 }
 0x2c3   : > { %4332 = vmatprep.subr.bf16.mxu1 %v4710_v37 }
 0x2c6   : > { %4333 = vmatpush3.bf16.msra.mxu1 %v4710_v37 }
 0x2c7   : > { %4334 = vmatprep.subr.bf16.mxu1 %v4711_v11 }
 0x2ca   : > { %4335 = vmatpush3.bf16.msra.mxu1 %v4711_v11 }
 0x2cb   : > { %4344 = vmatprep.subr.bf16.mxu1 %v4713_v39 }
 0x2cd   : > { %4337 = vmatmul.mubr.bf16.vlgmr.msra.gmra.mrb[0].mxu1 %v4712_v48 }
 0x2ce   : > { %4340 = vmatprep.mubr.bf16.mxu1 %v4714_v23  ;;  %4345 = vmatpush3.bf16.msra.mxu1 %v4713_v39 }
 0x2cf   : > { %4346 = vmatprep.subr.bf16.mxu1 %v4715_v3 }
 0x2d2   : > { %4347 = vmatpush3.bf16.msra.mxu1 %v4715_v3 }
 0x2d3   : > { %4348 = vmatprep.subr.bf16.mxu1 %v4717_v24 }
 0x2d5   : > { %4341 = vmatmul.mubr.bf16.gmra.mrb[4].mxu1 %v4716_v56 }
 0x2d6   : > { %4349 = vmatpush3.bf16.msra.mxu1 %v4717_v24  ;;  %4360 = vmatprep.mubr.bf16.mxu1 %v3190_v19 }
 0x2d7   : > { %4350 = vmatprep.subr.bf16.mxu1 %v4720_v38 }
 0x2da   : > { %4351 = vmatpush3.bf16.msra.mxu1 %v4720_v38 }
 0x2db   : > { %4352 = vmatprep.subr.bf16.mxu1 %v4721_v33 }
 0x2de   : > { %4353 = vmatpush3.bf16.msra.mxu1 %v4721_v33 }
 0x2df   : > { %4354 = vmatprep.subr.bf16.mxu1 %v4722_v8 }
 0x2e2   : > { %4355 = vmatpush3.bf16.msra.mxu1 %v4722_v8 }
 0x2e3   : > { %4356 = vmatprep.subr.bf16.mxu1 %v4723_v17 }
 0x2e6   : > { %4357 = vmatpush3.bf16.msra.mxu1 %v4723_v17 }
 0x2e7   : > { %4358 = vmatprep.subr.bf16.mxu1 %v4724_v43 }
 0x2ea   : > { %4359 = vmatpush3.bf16.msra.mxu1 %v4724_v43 }
 0x2ed   : > { %4361 = vmatmul.mubr.bf16.vlgmr.msra.gmra.mrb[0].mxu1 %v3198_v9 }
 0x2ee   : > { %4364 = vmatprep.mubr.bf16.mxu1 %v3206_v15 }
 0x2f5   : > { %4365 = vmatmul.mubr.bf16.gmra.mrb[4].mxu1 %v3214_v21 }
 0x31a   : > { %v4194_v25 = vpop.f32.mrb[8].mxu0 }
 0x31b   : > { %v1926_v52 = vpop.f32.mrb[9].mxu0  ;;  %v4368_v55 = vadd.f32 %v4194_v25, %v3599_v32 }
 0x31c   : > { %v4195_v2 = vpop.f32.mrb[10].mxu0  ;;  %v4370_v28 = vadd.f32 %v3599_v32, %v1926_v52 }
 0x31d   : > { %v1929_v47 = vpop.f32.mrb[11].mxu0  ;;  %v4372_v29 = vadd.f32 %v4195_v2, %v3599_v32 }
 0x31e   : > { %v4374_v5 = vadd.f32 %v3599_v32, %v1929_v47 }
 0x322   : > { %v4198_v40 = vpop.f32.mrb[12].mxu0 }
 0x323   : > { %v1942_v41 = vpop.f32.mrb[13].mxu0  ;;  %v4376_v63 = vadd.f32 %v4198_v40, %v3599_v32 }
 0x324   : > { %v4199_v51 = vpop.f32.mrb[14].mxu0  ;;  %v4378_v37 = vadd.f32 %v3599_v32, %v1942_v41 }
 0x325   : > { %v1945_v0 = vpop.f32.mrb[15].mxu0  ;;  %v4380_v39 = vadd.f32 %v4199_v51, %v3599_v32 }
 0x326   : > { %v4382_v48 = vadd.f32 %v3599_v32, %v1945_v0 }
 0x3c0   : > { %v4362_v30 = vpop.f32.mrb[0].mxu1 }
 0x3c1   : > { %v4369_v58 = vadd.f32 %v4368_v55, %v4362_v30  ;;  %v3301_v57 = vpop.f32.mrb[1].mxu1 }
 0x3c2   : > { %v4371_v12 = vadd.f32 %v4370_v28, %v3301_v57  ;;  %v4363_v4 = vpop.f32.mrb[2].mxu1 }
 0x3c3   : > { %v4373_v61 = vadd.f32 %v4372_v29, %v4363_v4  ;;  %v3304_v46 = vpop.f32.mrb[3].mxu1 }
 0x3c4   : > { %v4375_v60 = vadd.f32 %v4374_v5, %v3304_v46 }
 0x3c5   : > { %v3837_v7 = vpack.c.bf16 %v4373_v61, %v4369_v58 }
 0x3c6   : > { %v3832_v18 = vpack.c.bf16 %v4375_v60, %v4371_v12 }
 0x3c7   : > { %3861 = vst [vmem:[%s338_s28 + $0x8] sm:$0xff] %v3837_v7  }
 0x3c8   : > { %3833 = vst [vmem:[%s338_s28] sm:$0xff] %v3832_v18   ;;  %v4366_v11 = vpop.f32.mrb[4].mxu1 }
 0x3c9   : > { %v4377_v1 = vadd.f32 %v4376_v63, %v4366_v11  ;;  %v3317_v49 = vpop.f32.mrb[5].mxu1 }
 0x3ca   : > { %v4379_v3 = vadd.f32 %v4378_v37, %v3317_v49  ;;  %v4367_v27 = vpop.f32.mrb[6].mxu1 }
 0x3cb   : > { %v4381_v23 = vadd.f32 %v4380_v39, %v4367_v27  ;;  %v3320_v53 = vpop.f32.mrb[7].mxu1 }
 0x3cc   : > { %v4383_v24 = vadd.f32 %v4382_v48, %v3320_v53 }
 0x3cd   : > { %v3847_v16 = vpack.c.bf16 %v4381_v23, %v4377_v1 }
 0x3ce   : > { %v3842_v59 = vpack.c.bf16 %v4383_v24, %v4379_v3 }
 0x3cf   : > { %3863 = vst [vmem:[%s338_s28 + $0x18] sm:$0xff] %v3847_v16  }
 0x3d0   : > { %3862 = vst [vmem:[%s338_s28 + $0x10] sm:$0xff] %v3842_v59  }
 0x3d1   : > { %4911 = shalt.err (!%p4908_p8)
}
 0x3d2   : > { %s4912_s30 = scalar_lea.hbm %s5693_s9, 512  ;;  %s4916_s7 = scalar_lea.hbm %s5743_s6, 1024 }
 0x3d3   : > { %p4913_p6 = scmp.ne.s32.totalorder %s5693_s9, %s4912_s30  ;;  %p4917_p0 = scmp.lt.u32.totalorder %s5693_s9, %s5743_s6 }
 0x3d4   : > { %p4918_p5 = scmp.lt.u32.totalorder %s4916_s7, %s4912_s30  ;;  %p4920_p7 = scmp.lt.u32.totalorder %s4912_s30, %s5693_s9 }
 0x3d5   : > { %p4914_p10 = pnand %p4913_p6, %p5806_p4 }
 0x3d6   : > { %p4919_p9 = por %p4918_p5, %p4917_p0 }
 0x3d7   : > { %p4915_p11 = pneg %p4914_p10 }
 0x3d8   : > { %p4921_p12 = por %p4920_p7, %p4919_p9 }
 0x3da   : > { %p4922_p13 = pnand %p4921_p12, %p4915_p11 }
 0x3dc   : > { %4925 = shalt.err (!%p4922_p13)
}
 0x3dd   : > { %s4988_s25 = smov 64   ;;  %s4989_s14 = smov 4  }
 0x3de   : > { %4494 = dma.vmem_to_hbm [thread:$0]  (%p5806_p4), %s5688_s19, 512, %s5693_s9, %s3381_s16, %s4988_s25, %s4988_s25, %s4989_s14  }
 0x3df PF: > { %s3409_s8 = sand.u32 1, %s4964_s21   ;;  %p5807_p1 = scmp.ne.s32.totalorder %s5758_s10, 0 }
 0x3e0   : > { %p5808_p3 = scmp.ge.s32.totalorder %s4976_s24, 2  ;;  %s3410_s27 = scalar_lea.sflag [#allocation9], %s3409_s8 }
 0x3e2   : > { %p4517_p2 = pnand %p5808_p3, %p5807_p1 }
 0x3e4   : > { %4959 = dma.done.wait (!%p4517_p2), %s3410_s27, 512  }
 0x3e5   : > { %4961 = vsyncadd (!%p4517_p2), %s3410_s27, 4294966784  ;;  %p22_p8 = scmp.ge.s32.totalorder %s5193_s15, 4   ;;  %s5809_s21 = smov %s4968_s22 }
 0x3e6   : > { %s5810_s22 = smov %s4972_s23  ;;  %s5811_s23 = smov %s5205_s17 }
 0x3e7   : > { %s5812_s24 = smov %s5193_s15  ;;  %24 = sbr.rel (!%p22_p8) target bundleno = 8 (0x8), region = 120 }
 0x3ee   :  { %3415 = vsyncpa [#allocation8], 1 }
 0x3ef   :  { %3417 = vsyncpa [#allocation8 + $0x1], 1 }
 0x3f0   :  { %3418 = vsyncpa [#allocation11], 1 }
 0x3f1   :  { %3419 = vsyncpa [#allocation14], 1 }
 0x3f2   :  { %3420 = vsyncpa [#allocation17], 1 }
 0x3f3   :  { %3421 = vsyncpa [#allocation9], 1 }
 0x3f4   :  { %3423 = vsyncpa [#allocation9 + $0x1], 1 }

</bundles_post_ra>
